<compile_context>
chip_gen: v5e
topology: v5e:2x2
jax: 0.10.0
libtpu: 0.0.40
codegen_flags: <defaults>
</compile_context>

<pallas_src>
import math

import jax
import jax.numpy as jnp
from jax.experimental import pallas as pl
from jax.experimental.pallas import tpu as pltpu


def _upsample_conv_kernel(xa_ref, xh0_ref, xh1_ref, w_ref, b_ref, o_ref,
                          xbuf_ref):
    """One (batch, row-tile) step of the polyphase upsample-conv.

    xa_ref  : [1, TR, W+2, C]      padded-input rows [t*TR, t*TR+TR)
    xh0_ref : [1, 1,  W+2, C]      halo row t*TR+TR
    xh1_ref : [1, 1,  W+2, C]      halo row t*TR+TR+1
    w_ref   : [8, 2C, C]           phase taps, index = a*4 + b*2 + p,
                                   contraction rows ordered q*C + cin
    b_ref   : [1, C]               bias (f32)
    o_ref   : [1, TR, 2, W, 2C]    output phases, layout (row, a, col, b*C+cout)
    xbuf_ref: [TR+2, W+1, 2C]      column-paired slab: [..., c, 0:C]  = col c,
                                   [..., c, C:2C] = col c+1
    """
    _, TR, _, W, C2 = o_ref.shape
    C = C2 // 2

    # ---- assemble the column-paired slab once per tile (no later concats) ----
    xa = xa_ref[0]            # [TR, W+2, C]
    h0 = xh0_ref[0]           # [1,  W+2, C]
    h1 = xh1_ref[0]           # [1,  W+2, C]

    xbuf_ref[0:TR, :, 0:C] = xa[:, 0:W + 1, :]
    xbuf_ref[0:TR, :, C:2 * C] = xa[:, 1:W + 2, :]
    xbuf_ref[TR:TR + 1, :, 0:C] = h0[:, 0:W + 1, :]
    xbuf_ref[TR:TR + 1, :, C:2 * C] = h0[:, 1:W + 2, :]
    xbuf_ref[TR + 1:TR + 2, :, 0:C] = h1[:, 0:W + 1, :]
    xbuf_ref[TR + 1:TR + 2, :, C:2 * C] = h1[:, 1:W + 2, :]

    bias = b_ref[...].astype(jnp.float32)                 # [1, C]

    def lhs(i, b):
        # K = 2C column-pair contraction for row shift i, column phase b.
        return xbuf_ref[i:i + TR, b:b + W, :].reshape(TR * W, 2 * C)

    # TODO(synk): for C <= 128 on 256-wide MXUs (v6e/v7x), fold both column
    # phases into a K=3C, N=2C contraction (zero-padded taps); kept K=2C/N=C
    # here since that fold is a straight loss on v5e's 128-wide MXU.
    accs = {}
    for b in range(2):                                     # output column phase
        slabs = [lhs(i, b) for i in range(3)]              # row shifts 0..2
        for a in range(2):                                 # output row phase
            base = a * 4 + b * 2
            acc = jnp.dot(slabs[a], w_ref[base],
                          preferred_element_type=jnp.float32)
            acc = acc + jnp.dot(slabs[a + 1], w_ref[base + 1],
                                preferred_element_type=jnp.float32)
            accs[(a, b)] = (acc + bias).reshape(TR, W, C)

    # Lane-dense epilogue: both column phases of a row phase in one store.
    for a in range(2):
        out_a = jnp.concatenate([accs[(a, 0)], accs[(a, 1)]], axis=-1)
        o_ref[0:1, :, a:a + 1, :, :] = (
            out_a.astype(o_ref.dtype).reshape(1, TR, 1, W, 2 * C))


def _vmem_bytes(TR, W, C, in_itemsize, out_itemsize):
    """VMEM estimate for one grid step (blocks, scratch, in-kernel temps)."""
    blk_in = TR * (W + 2) * C * in_itemsize          # main row tile
    blk_halo = 2 * (W + 2) * C * in_itemsize         # two 1-row halo blocks
    blk_out = TR * 2 * W * 2 * C * out_itemsize      # output tile
    blk_w = 8 * 2 * C * C * in_itemsize              # phase weights
    blk_b = C * 4                                    # bias (f32)
    scratch = (TR + 2) * (W + 1) * 2 * C * in_itemsize   # column-paired slab
    # In-kernel temporaries: 3 live LHS slabs (cdt) + 4 f32 phase accumulators.
    temps = 3 * TR * W * 2 * C * in_itemsize + 4 * TR * W * C * 4
    # The auto-pipeline double-buffers every in/out block.
    return 2 * (blk_in + blk_halo + blk_out + blk_w + blk_b) + scratch + temps


def _vmem_capacity_bytes():
    """Physical VMEM of the local TPU generation (conservative fallback: 64 MiB)."""
    try:
        info = pltpu.get_tpu_info()
        cap = getattr(info, "vmem_capacity_bytes", None)
        if cap:
            return int(cap)
    except Exception:
        pass
    return 64 * 1024 * 1024


def _vmem_budget_and_limit():
    cap = _vmem_capacity_bytes()
    if cap >= 100 * 1024 * 1024:                    # v5e / v6e (128 MiB parts)
        return 90 * 1024 * 1024, 100 * 1024 * 1024
    return 40 * 1024 * 1024, 48 * 1024 * 1024       # v7x (64 MiB part)


def _pick_tile_rows(N, H, W, C, in_itemsize, out_itemsize, budget):
    """Largest row tile (divisor of H) under the VMEM budget, preferring
    >= 4 total grid steps so both v7x TensorCores get pipelined work."""
    divisors = sorted((d for d in range(1, H + 1) if H % d == 0), reverse=True)
    fitting = [d for d in divisors
               if _vmem_bytes(d, W, C, in_itemsize, out_itemsize) <= budget]
    if not fitting:
        return 1
    pipelined = [d for d in fitting if N * (H // d) >= 4] or fitting
    return pipelined[0]


def upsample_forward(x_nchw, weight_oihw, bias, time_emb=None, classes=None,
                     compute_dtype=None):
    """Pallas equivalent of Upsample.forward (nearest 2x + Conv2d(C, C, 3, pad=1)).

    time_emb / classes are accepted (and ignored) to match the PyTorch call
    signature.  compute_dtype defaults to bf16 (MXU-native, f32 accumulate);
    pass jnp.float32 for bit-accurate f32 semantics.
    """
    N, C, H, W = x_nchw.shape
    out_dtype = x_nchw.dtype
    cdt = jnp.dtype(compute_dtype) if compute_dtype is not None else jnp.dtype(jnp.bfloat16)

    # ---- layout glue (would vanish in an NHWC model) ------------------------
    x_nhwc = jnp.transpose(x_nchw, (0, 2, 3, 1))                      # [N, H, W, C]
    # Polyphase: pad the ORIGINAL-resolution input by 1; the 2x-upsampled
    # image is never built in HBM.
    # TODO(synk): fold the zero-padding into the kernel (edge-tile pl.when) to
    # drop this extra HBM pass on memory-bound shapes.
    x_pad = jnp.pad(x_nhwc, ((0, 0), (1, 1), (1, 1), (0, 0))).astype(cdt)

    # ---- pre-combine the 3x3 taps into 4 polyphase 2x2 kernels ---------------
    # rcomb[a, p, dy] / ccomb[b, q, dx]: which original rows/cols each
    # (phase, tap) touches once the nearest-2x repeat is folded in.
    rcomb = jnp.array([[[1., 0., 0.], [0., 1., 1.]],
                       [[1., 1., 0.], [0., 0., 1.]]], dtype=jnp.float32)
    ccomb = rcomb
    w_t = jnp.transpose(weight_oihw, (2, 3, 1, 0)).astype(jnp.float32)  # [ky,kx,Cin,Cout]
    w_ph = jnp.einsum('apy,bqx,yxio->abpqio', rcomb, ccomb, w_t)        # [2,2,2,2,C,C]
    # (a, b, p) major; contraction rows ordered q*C + cin -> K = 2C matmuls.
    # Quantize to the compute dtype only AFTER the f32 pre-combination.
    w_cat = w_ph.reshape(8, 2 * C, C).astype(cdt)
    b2d = bias.reshape(1, C).astype(jnp.float32)

    budget, limit_cap = _vmem_budget_and_limit()
    in_isz = cdt.itemsize
    out_isz = jnp.dtype(out_dtype).itemsize
    TR = _pick_tile_rows(N, H, W, C, in_isz, out_isz, budget)
    grid = (N, H // TR)
    vmem_est = _vmem_bytes(TR, W, C, in_isz, out_isz)
    vmem_limit = int(min(max(vmem_est + 8 * 1024 * 1024, 32 * 1024 * 1024),
                         limit_cap))

    out5 = pl.pallas_call(
        _upsample_conv_kernel,
        out_shape=jax.ShapeDtypeStruct((N, H, 2, W, 2 * C), out_dtype),
        grid_spec=pltpu.PrefetchScalarGridSpec(
            num_scalar_prefetch=0,
            grid=grid,
            in_specs=[
                # row tile of the 1-padded original-resolution input
                pl.BlockSpec((1, TR, W + 2, C), lambda n, t: (n, t, 0, 0)),
                # 2-row halo, fetched as two 1-row blocks (block size 1 along
                # that axis, so the index map may return element-exact rows)
                pl.BlockSpec((1, 1, W + 2, C), lambda n, t: (n, t * TR + TR, 0, 0)),
                pl.BlockSpec((1, 1, W + 2, C), lambda n, t: (n, t * TR + TR + 1, 0, 0)),
                pl.BlockSpec((8, 2 * C, C), lambda n, t: (0, 0, 0)),
                pl.BlockSpec((1, C), lambda n, t: (0, 0)),
            ],
            out_specs=pl.BlockSpec((1, TR, 2, W, 2 * C),
                                   lambda n, t: (n, t, 0, 0, 0)),
            scratch_shapes=[
                # column-paired slab: [..., c, 0:C] = col c, [..., C:2C] = col c+1
                pltpu.VMEM((TR + 2, W + 1, 2 * C), cdt),
            ],
        ),
        compiler_params=pltpu.CompilerParams(
            dimension_semantics=("parallel", "parallel"),
            vmem_limit_bytes=vmem_limit,
        ),
    )(x_pad, x_pad, x_pad, w_cat, b2d)

    # Free (row-major) reshape: [N, H, 2, W, 2, C] interleave == nearest-2x grid.
    out_nhwc = out5.reshape(N, 2 * H, 2 * W, C)
    return jnp.transpose(out_nhwc, (0, 3, 1, 2))                      # [N, C, 2H, 2W]


def _reference_forward(x_nchw, weight_oihw, bias):
    """Pure-JAX reference (nearest 2x upsample + 3x3 same conv)."""
    x_up = jnp.repeat(jnp.repeat(x_nchw, 2, axis=2), 2, axis=3)
    out = jax.lax.conv_general_dilated(
        x_up, weight_oihw, window_strides=(1, 1), padding=((1, 1), (1, 1)),
        dimension_numbers=("NCHW", "OIHW", "NCHW"))
    return out + bias[None, :, None, None]


if __name__ == "__main__":
    N, C, H, W = 2, 4, 16, 16

    key = jax.random.PRNGKey(0)
    kx, kw, kb = jax.random.split(key, 3)

    x = jax.random.normal(kx, (N, C, H, W), dtype=jnp.float32)

    # Deterministic Conv2d(C, C, 3) init, PyTorch-style uniform(-b, b), b = 1/sqrt(fan_in)
    fan_in = C * 3 * 3
    bound = 1.0 / math.sqrt(fan_in)
    weight = jax.random.uniform(kw, (C, C, 3, 3), jnp.float32, -bound, bound)
    bias = jax.random.uniform(kb, (C,), jnp.float32, -bound, bound)

    ref = _reference_forward(x, weight, bias)

    # f32 compute path: the polyphase transform itself is exact.
    out_f32 = upsample_forward(x, weight, bias, compute_dtype=jnp.float32)
    out_f32 = jax.block_until_ready(out_f32)
    assert out_f32.shape == (N, C, 2 * H, 2 * W), out_f32.shape
    err_f32 = float(jnp.max(jnp.abs(out_f32 - ref)))
    assert err_f32 < 1e-4, err_f32

    # Default fast path: bf16 MXU compute with f32 accumulation.
    out = upsample_forward(x, weight, bias)
    out = jax.block_until_ready(out)
    assert out.shape == (N, C, 2 * H, 2 * W), out.shape
    err_bf16 = float(jnp.max(jnp.abs(out - ref)))
    assert err_bf16 < 5e-2, err_bf16

    print("KERNEL_OK")
</pallas_src>

<mosaic_0001>
module attributes {stable_mosaic.version = 11 : i64} {
  func.func @_upsample_conv_kernel(%arg0: i32, %arg1: i32, %arg2: memref<1x8x18x4xf32, #tpu.memory_space<vmem>>, %arg3: memref<1x1x18x4xf32, #tpu.memory_space<vmem>>, %arg4: memref<1x1x18x4xf32, #tpu.memory_space<vmem>>, %arg5: memref<8x8x4xf32, #tpu.memory_space<vmem>>, %arg6: memref<1x4xf32, #tpu.memory_space<vmem>>, %arg7: memref<1x8x2x16x8xf32, #tpu.memory_space<vmem>>, %arg8: memref<10x17x8xf32, #tpu.memory_space<vmem>>) attributes {dimension_semantics = [#tpu.dimension_semantics<parallel>, #tpu.dimension_semantics<parallel>], iteration_bounds = array<i64: 2, 2>, scalar_prefetch = 0 : i64, scratch_operands = 1 : i64, tpu.core_type = #tpu.core_type<tc>, window_params = [{transform_indices = @transform_0, window_bounds = array<i64: 1, 8, 18, 4>}, {transform_indices = @transform_1, window_bounds = array<i64: 1, 1, 18, 4>}, {transform_indices = @transform_2, window_bounds = array<i64: 1, 1, 18, 4>}, {pipeline_mode = #tpu.pipeline_mode<synchronous>, transform_indices = @transform_3, window_bounds = array<i64: 8, 8, 4>}, {pipeline_mode = #tpu.pipeline_mode<synchronous>, transform_indices = @transform_4, window_bounds = array<i64: 1, 4>}, {transform_indices = @transform_5, window_bounds = array<i64: 1, 8, 2, 16, 8>}]} {
    %c0 = arith.constant 0 : index
    %c0_0 = arith.constant 0 : index
    %c0_1 = arith.constant 0 : index
    %c0_2 = arith.constant 0 : index
    %0 = vector.load %arg2[%c0, %c0_0, %c0_1, %c0_2] : memref<1x8x18x4xf32, #tpu.memory_space<vmem>>, vector<1x8x18x4xf32>
    %1 = vector.shape_cast %0 : vector<1x8x18x4xf32> to vector<8x18x4xf32>
    %c0_3 = arith.constant 0 : index
    %c0_4 = arith.constant 0 : index
    %c0_5 = arith.constant 0 : index
    %c0_6 = arith.constant 0 : index
    %2 = vector.load %arg3[%c0_3, %c0_4, %c0_5, %c0_6] : memref<1x1x18x4xf32, #tpu.memory_space<vmem>>, vector<1x1x18x4xf32>
    %3 = vector.shape_cast %2 : vector<1x1x18x4xf32> to vector<1x18x4xf32>
    %c0_7 = arith.constant 0 : index
    %c0_8 = arith.constant 0 : index
    %c0_9 = arith.constant 0 : index
    %c0_10 = arith.constant 0 : index
    %4 = vector.load %arg4[%c0_7, %c0_8, %c0_9, %c0_10] : memref<1x1x18x4xf32, #tpu.memory_space<vmem>>, vector<1x1x18x4xf32>
    %5 = vector.shape_cast %4 : vector<1x1x18x4xf32> to vector<1x18x4xf32>
    %6 = vector.extract_strided_slice %1 {offsets = [0, 0, 0], sizes = [8, 17, 4], strides = [1, 1, 1]} : vector<8x18x4xf32> to vector<8x17x4xf32>
    %c0_11 = arith.constant 0 : index
    %c0_12 = arith.constant 0 : index
    %c0_13 = arith.constant 0 : index
    %7 = vector.load %arg8[%c0_11, %c0_12, %c0_13] : memref<10x17x8xf32, #tpu.memory_space<vmem>>, vector<8x17x4xf32>
    tpu.vector_store %arg8[%c0_11, %c0_12, %c0_13], %6 {strides = array<i32>} : memref<10x17x8xf32, #tpu.memory_space<vmem>>, vector<8x17x4xf32>,
    %8 = vector.extract_strided_slice %1 {offsets = [0, 1, 0], sizes = [8, 17, 4], strides = [1, 1, 1]} : vector<8x18x4xf32> to vector<8x17x4xf32>
    %c0_14 = arith.constant 0 : index
    %c0_15 = arith.constant 0 : index
    %c4 = arith.constant 4 : index
    %9 = vector.load %arg8[%c0_14, %c0_15, %c4] : memref<10x17x8xf32, #tpu.memory_space<vmem>>, vector<8x17x4xf32>
    tpu.vector_store %arg8[%c0_14, %c0_15, %c4], %8 {strides = array<i32>} : memref<10x17x8xf32, #tpu.memory_space<vmem>>, vector<8x17x4xf32>,
    %10 = vector.extract_strided_slice %3 {offsets = [0, 0, 0], sizes = [1, 17, 4], strides = [1, 1, 1]} : vector<1x18x4xf32> to vector<1x17x4xf32>
    %c8 = arith.constant 8 : index
    %c0_16 = arith.constant 0 : index
    %c0_17 = arith.constant 0 : index
    %11 = vector.load %arg8[%c8, %c0_16, %c0_17] : memref<10x17x8xf32, #tpu.memory_space<vmem>>, vector<1x17x4xf32>
    tpu.vector_store %arg8[%c8, %c0_16, %c0_17], %10 {strides = array<i32>} : memref<10x17x8xf32, #tpu.memory_space<vmem>>, vector<1x17x4xf32>,
    %12 = vector.extract_strided_slice %3 {offsets = [0, 1, 0], sizes = [1, 17, 4], strides = [1, 1, 1]} : vector<1x18x4xf32> to vector<1x17x4xf32>
    %c8_18 = arith.constant 8 : index
    %c0_19 = arith.constant 0 : index
    %c4_20 = arith.constant 4 : index
    %13 = vector.load %arg8[%c8_18, %c0_19, %c4_20] : memref<10x17x8xf32, #tpu.memory_space<vmem>>, vector<1x17x4xf32>
    tpu.vector_store %arg8[%c8_18, %c0_19, %c4_20], %12 {strides = array<i32>} : memref<10x17x8xf32, #tpu.memory_space<vmem>>, vector<1x17x4xf32>,
    %14 = vector.extract_strided_slice %5 {offsets = [0, 0, 0], sizes = [1, 17, 4], strides = [1, 1, 1]} : vector<1x18x4xf32> to vector<1x17x4xf32>
    %c9 = arith.constant 9 : index
    %c0_21 = arith.constant 0 : index
    %c0_22 = arith.constant 0 : index
    %15 = vector.load %arg8[%c9, %c0_21, %c0_22] : memref<10x17x8xf32, #tpu.memory_space<vmem>>, vector<1x17x4xf32>
    tpu.vector_store %arg8[%c9, %c0_21, %c0_22], %14 {strides = array<i32>} : memref<10x17x8xf32, #tpu.memory_space<vmem>>, vector<1x17x4xf32>,
    %16 = vector.extract_strided_slice %5 {offsets = [0, 1, 0], sizes = [1, 17, 4], strides = [1, 1, 1]} : vector<1x18x4xf32> to vector<1x17x4xf32>
    %c9_23 = arith.constant 9 : index
    %c0_24 = arith.constant 0 : index
    %c4_25 = arith.constant 4 : index
    %17 = vector.load %arg8[%c9_23, %c0_24, %c4_25] : memref<10x17x8xf32, #tpu.memory_space<vmem>>, vector<1x17x4xf32>
    tpu.vector_store %arg8[%c9_23, %c0_24, %c4_25], %16 {strides = array<i32>} : memref<10x17x8xf32, #tpu.memory_space<vmem>>, vector<1x17x4xf32>,
    %c0_26 = arith.constant 0 : index
    %c0_27 = arith.constant 0 : index
    %18 = vector.load %arg6[%c0_26, %c0_27] : memref<1x4xf32, #tpu.memory_space<vmem>>, vector<1x4xf32>
    %c0_28 = arith.constant 0 : index
    %c0_29 = arith.constant 0 : index
    %c0_30 = arith.constant 0 : index
    %19 = vector.load %arg8[%c0_28, %c0_29, %c0_30] : memref<10x17x8xf32, #tpu.memory_space<vmem>>, vector<8x16x8xf32>
    %20 = vector.shape_cast %19 : vector<8x16x8xf32> to vector<128x8xf32>
    %c1 = arith.constant 1 : index
    %c0_31 = arith.constant 0 : index
    %c0_32 = arith.constant 0 : index
    %21 = vector.load %arg8[%c1, %c0_31, %c0_32] : memref<10x17x8xf32, #tpu.memory_space<vmem>>, vector<8x16x8xf32>
    %22 = vector.shape_cast %21 : vector<8x16x8xf32> to vector<128x8xf32>
    %c2 = arith.constant 2 : index
    %c0_33 = arith.constant 0 : index
    %c0_34 = arith.constant 0 : index
    %23 = vector.load %arg8[%c2, %c0_33, %c0_34] : memref<10x17x8xf32, #tpu.memory_space<vmem>>, vector<8x16x8xf32>
    %24 = vector.shape_cast %23 : vector<8x16x8xf32> to vector<128x8xf32>
    %c0_35 = arith.constant 0 : index
    %c0_36 = arith.constant 0 : index
    %c0_37 = arith.constant 0 : index
    %25 = vector.load %arg5[%c0_35, %c0_36, %c0_37] : memref<8x8x4xf32, #tpu.memory_space<vmem>>, vector<1x8x4xf32>
    %26 = vector.shape_cast %25 : vector<1x8x4xf32> to vector<8x4xf32>
    %cst = arith.constant dense<0.000000e+00> : vector<128x4xf32>
    %27 = tpu.matmul %20, %26, %cst {dimension_numbers = #tpu.dot_dimension_numbers<[1], [0], [0], [1], [0, 0, 1, 1], [], []>} : vector<128x8xf32>, vector<8x4xf32>, vector<128x4xf32> -> vector<128x4xf32>
    %c1_38 = arith.constant 1 : index
    %c0_39 = arith.constant 0 : index
    %c0_40 = arith.constant 0 : index
    %28 = vector.load %arg5[%c1_38, %c0_39, %c0_40] : memref<8x8x4xf32, #tpu.memory_space<vmem>>, vector<1x8x4xf32>
    %29 = vector.shape_cast %28 : vector<1x8x4xf32> to vector<8x4xf32>
    %cst_41 = arith.constant dense<0.000000e+00> : vector<128x4xf32>
    %30 = tpu.matmul %22, %29, %cst_41 {dimension_numbers = #tpu.dot_dimension_numbers<[1], [0], [0], [1], [0, 0, 1, 1], [], []>} : vector<128x8xf32>, vector<8x4xf32>, vector<128x4xf32> -> vector<128x4xf32>
    %31 = arith.addf %27, %30 : vector<128x4xf32>
    %32 = vector.broadcast %18 : vector<1x4xf32> to vector<128x4xf32>
    %33 = arith.addf %31, %32 : vector<128x4xf32>
    %34 = vector.shape_cast %33 : vector<128x4xf32> to vector<8x16x4xf32>
    %c4_42 = arith.constant 4 : index
    %c0_43 = arith.constant 0 : index
    %c0_44 = arith.constant 0 : index
    %35 = vector.load %arg5[%c4_42, %c0_43, %c0_44] : memref<8x8x4xf32, #tpu.memory_space<vmem>>, vector<1x8x4xf32>
    %36 = vector.shape_cast %35 : vector<1x8x4xf32> to vector<8x4xf32>
    %cst_45 = arith.constant dense<0.000000e+00> : vector<128x4xf32>
    %37 = tpu.matmul %22, %36, %cst_45 {dimension_numbers = #tpu.dot_dimension_numbers<[1], [0], [0], [1], [0, 0, 1, 1], [], []>} : vector<128x8xf32>, vector<8x4xf32>, vector<128x4xf32> -> vector<128x4xf32>
    %c5 = arith.constant 5 : index
    %c0_46 = arith.constant 0 : index
    %c0_47 = arith.constant 0 : index
    %38 = vector.load %arg5[%c5, %c0_46, %c0_47] : memref<8x8x4xf32, #tpu.memory_space<vmem>>, vector<1x8x4xf32>
    %39 = vector.shape_cast %38 : vector<1x8x4xf32> to vector<8x4xf32>
    %cst_48 = arith.constant dense<0.000000e+00> : vector<128x4xf32>
    %40 = tpu.matmul %24, %39, %cst_48 {dimension_numbers = #tpu.dot_dimension_numbers<[1], [0], [0], [1], [0, 0, 1, 1], [], []>} : vector<128x8xf32>, vector<8x4xf32>, vector<128x4xf32> -> vector<128x4xf32>
    %41 = arith.addf %37, %40 : vector<128x4xf32>
    %42 = vector.broadcast %18 : vector<1x4xf32> to vector<128x4xf32>
    %43 = arith.addf %41, %42 : vector<128x4xf32>
    %44 = vector.shape_cast %43 : vector<128x4xf32> to vector<8x16x4xf32>
    %c0_49 = arith.constant 0 : index
    %c1_50 = arith.constant 1 : index
    %c0_51 = arith.constant 0 : index
    %45 = vector.load %arg8[%c0_49, %c1_50, %c0_51] : memref<10x17x8xf32, #tpu.memory_space<vmem>>, vector<8x16x8xf32>
    %46 = vector.shape_cast %45 : vector<8x16x8xf32> to vector<128x8xf32>
    %c1_52 = arith.constant 1 : index
    %c1_53 = arith.constant 1 : index
    %c0_54 = arith.constant 0 : index
    %47 = vector.load %arg8[%c1_52, %c1_53, %c0_54] : memref<10x17x8xf32, #tpu.memory_space<vmem>>, vector<8x16x8xf32>
    %48 = vector.shape_cast %47 : vector<8x16x8xf32> to vector<128x8xf32>
    %c2_55 = arith.constant 2 : index
    %c1_56 = arith.constant 1 : index
    %c0_57 = arith.constant 0 : index
    %49 = vector.load %arg8[%c2_55, %c1_56, %c0_57] : memref<10x17x8xf32, #tpu.memory_space<vmem>>, vector<8x16x8xf32>
    %50 = vector.shape_cast %49 : vector<8x16x8xf32> to vector<128x8xf32>
    %c2_58 = arith.constant 2 : index
    %c0_59 = arith.constant 0 : index
    %c0_60 = arith.constant 0 : index
    %51 = vector.load %arg5[%c2_58, %c0_59, %c0_60] : memref<8x8x4xf32, #tpu.memory_space<vmem>>, vector<1x8x4xf32>
    %52 = vector.shape_cast %51 : vector<1x8x4xf32> to vector<8x4xf32>
    %cst_61 = arith.constant dense<0.000000e+00> : vector<128x4xf32>
    %53 = tpu.matmul %46, %52, %cst_61 {dimension_numbers = #tpu.dot_dimension_numbers<[1], [0], [0], [1], [0, 0, 1, 1], [], []>} : vector<128x8xf32>, vector<8x4xf32>, vector<128x4xf32> -> vector<128x4xf32>
    %c3 = arith.constant 3 : index
    %c0_62 = arith.constant 0 : index
    %c0_63 = arith.constant 0 : index
    %54 = vector.load %arg5[%c3, %c0_62, %c0_63] : memref<8x8x4xf32, #tpu.memory_space<vmem>>, vector<1x8x4xf32>
    %55 = vector.shape_cast %54 : vector<1x8x4xf32> to vector<8x4xf32>
    %cst_64 = arith.constant dense<0.000000e+00> : vector<128x4xf32>
    %56 = tpu.matmul %48, %55, %cst_64 {dimension_numbers = #tpu.dot_dimension_numbers<[1], [0], [0], [1], [0, 0, 1, 1], [], []>} : vector<128x8xf32>, vector<8x4xf32>, vector<128x4xf32> -> vector<128x4xf32>
    %57 = arith.addf %53, %56 : vector<128x4xf32>
    %58 = vector.broadcast %18 : vector<1x4xf32> to vector<128x4xf32>
    %59 = arith.addf %57, %58 : vector<128x4xf32>
    %60 = vector.shape_cast %59 : vector<128x4xf32> to vector<8x16x4xf32>
    %c6 = arith.constant 6 : index
    %c0_65 = arith.constant 0 : index
    %c0_66 = arith.constant 0 : index
    %61 = vector.load %arg5[%c6, %c0_65, %c0_66] : memref<8x8x4xf32, #tpu.memory_space<vmem>>, vector<1x8x4xf32>
    %62 = vector.shape_cast %61 : vector<1x8x4xf32> to vector<8x4xf32>
    %cst_67 = arith.constant dense<0.000000e+00> : vector<128x4xf32>
    %63 = tpu.matmul %48, %62, %cst_67 {dimension_numbers = #tpu.dot_dimension_numbers<[1], [0], [0], [1], [0, 0, 1, 1], [], []>} : vector<128x8xf32>, vector<8x4xf32>, vector<128x4xf32> -> vector<128x4xf32>
    %c7 = arith.constant 7 : index
    %c0_68 = arith.constant 0 : index
    %c0_69 = arith.constant 0 : index
    %64 = vector.load %arg5[%c7, %c0_68, %c0_69] : memref<8x8x4xf32, #tpu.memory_space<vmem>>, vector<1x8x4xf32>
    %65 = vector.shape_cast %64 : vector<1x8x4xf32> to vector<8x4xf32>
    %cst_70 = arith.constant dense<0.000000e+00> : vector<128x4xf32>
    %66 = tpu.matmul %50, %65, %cst_70 {dimension_numbers = #tpu.dot_dimension_numbers<[1], [0], [0], [1], [0, 0, 1, 1], [], []>} : vector<128x8xf32>, vector<8x4xf32>, vector<128x4xf32> -> vector<128x4xf32>
    %67 = arith.addf %63, %66 : vector<128x4xf32>
    %68 = vector.broadcast %18 : vector<1x4xf32> to vector<128x4xf32>
    %69 = arith.addf %67, %68 : vector<128x4xf32>
    %70 = vector.shape_cast %69 : vector<128x4xf32> to vector<8x16x4xf32>
    %71 = tpu.concatenate %34, %60 in 2 : vector<8x16x4xf32>, vector<8x16x4xf32> -> vector<8x16x8xf32>
    %72 = vector.shape_cast %71 : vector<8x16x8xf32> to vector<1x8x1x16x8xf32>
    %c0_71 = arith.constant 0 : index
    %c0_72 = arith.constant 0 : index
    %c0_73 = arith.constant 0 : index
    %c0_74 = arith.constant 0 : index
    %c0_75 = arith.constant 0 : index
    %73 = vector.load %arg7[%c0_71, %c0_72, %c0_73, %c0_74, %c0_75] : memref<1x8x2x16x8xf32, #tpu.memory_space<vmem>>, vector<1x8x1x16x8xf32>
    tpu.vector_store %arg7[%c0_71, %c0_72, %c0_73, %c0_74, %c0_75], %72 {strides = array<i32>} : memref<1x8x2x16x8xf32, #tpu.memory_space<vmem>>, vector<1x8x1x16x8xf32>,
    %74 = tpu.concatenate %44, %70 in 2 : vector<8x16x4xf32>, vector<8x16x4xf32> -> vector<8x16x8xf32>
    %75 = vector.shape_cast %74 : vector<8x16x8xf32> to vector<1x8x1x16x8xf32>
    %c0_76 = arith.constant 0 : index
    %c0_77 = arith.constant 0 : index
    %c1_78 = arith.constant 1 : index
    %c0_79 = arith.constant 0 : index
    %c0_80 = arith.constant 0 : index
    %76 = vector.load %arg7[%c0_76, %c0_77, %c1_78, %c0_79, %c0_80] : memref<1x8x2x16x8xf32, #tpu.memory_space<vmem>>, vector<1x8x1x16x8xf32>
    tpu.vector_store %arg7[%c0_76, %c0_77, %c1_78, %c0_79, %c0_80], %75 {strides = array<i32>} : memref<1x8x2x16x8xf32, #tpu.memory_space<vmem>>, vector<1x8x1x16x8xf32>,
    return
  }
  func.func @transform_0(%arg0: i32, %arg1: i32) -> (i32, i32, i32, i32) {
    %c0_i32 = arith.constant 0 : i32
    %c0_i32_0 = arith.constant 0 : i32
    %c0_i32_1 = arith.constant 0 : i32
    return %arg0, %arg1, %c0_i32, %c0_i32_0 : i32, i32, i32, i32
  }
  func.func @transform_1(%arg0: i32, %arg1: i32) -> (i32, i32, i32, i32) {
    %c8_i32 = arith.constant 8 : i32
    %0 = arith.muli %arg1, %c8_i32 : i32
    %c8_i32_0 = arith.constant 8 : i32
    %1 = arith.addi %0, %c8_i32_0 : i32
    %c0_i32 = arith.constant 0 : i32
    %c0_i32_1 = arith.constant 0 : i32
    %c0_i32_2 = arith.constant 0 : i32
    return %arg0, %1, %c0_i32, %c0_i32_1 : i32, i32, i32, i32
  }
  func.func @transform_2(%arg0: i32, %arg1: i32) -> (i32, i32, i32, i32) {
    %c8_i32 = arith.constant 8 : i32
    %0 = arith.muli %arg1, %c8_i32 : i32
    %c8_i32_0 = arith.constant 8 : i32
    %1 = arith.addi %0, %c8_i32_0 : i32
    %c1_i32 = arith.constant 1 : i32
    %2 = arith.addi %1, %c1_i32 : i32
    %c0_i32 = arith.constant 0 : i32
    %c0_i32_1 = arith.constant 0 : i32
    %c0_i32_2 = arith.constant 0 : i32
    return %arg0, %2, %c0_i32, %c0_i32_1 : i32, i32, i32, i32
  }
  func.func @transform_3(%arg0: i32, %arg1: i32) -> (i32, i32, i32) {
    %c0_i32 = arith.constant 0 : i32
    %c0_i32_0 = arith.constant 0 : i32
    %c0_i32_1 = arith.constant 0 : i32
    %c0_i32_2 = arith.constant 0 : i32
    return %c0_i32, %c0_i32_0, %c0_i32_1 : i32, i32, i32
  }
  func.func @transform_4(%arg0: i32, %arg1: i32) -> (i32, i32) {
    %c0_i32 = arith.constant 0 : i32
    %c0_i32_0 = arith.constant 0 : i32
    %c0_i32_1 = arith.constant 0 : i32
    return %c0_i32, %c0_i32_0 : i32, i32
  }
  func.func @transform_5(%arg0: i32, %arg1: i32) -> (i32, i32, i32, i32, i32) {
    %c0_i32 = arith.constant 0 : i32
    %c0_i32_0 = arith.constant 0 : i32
    %c0_i32_1 = arith.constant 0 : i32
    %c0_i32_2 = arith.constant 0 : i32
    return %arg0, %arg1, %c0_i32, %c0_i32_0, %c0_i32_1 : i32, i32, i32, i32, i32
  }
}

</mosaic_0001>

<bundles_post_ra>
// kernel: tpu_custom_call.1
= control target key start
LH: loop header
LB: loop body
LE: loop exit
PB: predicated region body
PF: predicated region fallthrough
CT: control target
= control target key end

     0   :  { %s2220_s18 = smov 0   ;;  %s2222_s19 = smov 0   ;;  %s2888_s0 = inlined_call_operand.vmem [shape: f32[2,18,18,4], index: 0, kind: input, shape index: {}]   ;;  %s2889_s1 = inlined_call_operand.vmem [shape: f32[2,18,18,4], index: 1, kind: input, shape index: {}]   ;;  %s2890_s2 = inlined_call_operand.vmem [shape: f32[2,18,18,4], index: 2, kind: input, shape index: {}]   ;;  %s2891_s3 = inlined_call_operand.vmem [shape: f32[8,8,4], index: 3, kind: input, shape index: {}]   ;;  %s2892_s4 = inlined_call_operand.vmem [shape: f32[1,4], index: 4, kind: input, shape index: {}]   ;;  %s2893_s5 = inlined_call_operand.vmem [shape: f32[2,16,2,16,8], index: 5, kind: output, shape index: {}]  }
   0x1   :  { %s2224_s20 = smov 0   ;;  %s2226_s21 = smov 0  }
   0x2   :  { %s2228_s22 = smov 0  }
   0x3 LB: > { %s24_s23 = sadd.s32 1, %s2179_s20  ;;  %s27_s24 = sadd.s32 1, %s2183_s21  ;;  %s2187_s22 = sphi %s2228_s22, %s15_s22   ;;  %s2183_s21 = sphi %s2226_s21, %s2897_s21   ;;  %s2179_s20 = sphi %s2224_s20, %s2896_s20   ;;  %s2175_s19 = sphi %s2222_s19, %s2895_s19   ;;  %s2171_s18 = sphi %s2220_s18, %s2894_s18  }
   0x4   : > { %p25_p0 = scmp.ge.s32.totalorder %s24_s23, 2  ;;  %p1939_p1 = scmp.ge.s32.totalorder %s2187_s22, 1 }
   0x5   : > { %p267_p2 = scmp.lt.s32.totalorder %s2187_s22, 5 }
   0x6   : > { %s2899_s23 = smov (%p25_p0, %s24_s23), 0  ;;  %s2901_s24 = smov (!%p25_p0, %s27_s24), %s2183_s21 }
   0x7   : > { %p268_p3 = pnand %p1939_p1, %p267_p2  ;;  %p29_p4 = scmp.ge.s32.totalorder %s2901_s24, 2 }
   0x8   : > { %s2250_s25 = sshll.u32 (!%p268_p3), %s2171_s18, 3  ;;  %p338_p5 = scmp.lt.s32.totalorder (!%p268_p3), %s2175_s19, 1 }
   0x9   : > { %s2903_s24 = smov (%p29_p4, %s2901_s24), 0  ;;  %271 = sbr.rel (%p268_p3) target bundleno = 658 (0x292), region = 40 }
   0xa   : > { %p340_p6 = scmp.lt.s32.totalorder (!%p268_p3), %s2250_s25, 17  ;;  %p382_p7 = scmp.lt.s32.totalorder (!%p268_p3), %s2250_s25, 15 }
   0xb   : > { %s2189_s13 = smov (!%p268_p3), 4   ;;  %s367_s14 = sadd.s32 (!%p268_p3), 9, %s2250_s25 }
   0xc   : > { %p370_p8 = scmp.lt.s32.totalorder (!%p268_p3), %s367_s14, 17  ;;  %s354_s17 = sadd.s32 (!%p268_p3), 8, %s2250_s25 }
   0xd   : > { %p357_p9 = scmp.lt.s32.totalorder (!%p268_p3), %s354_s17, 17 }
   0xe   : > { %s2905_s19 = smov (!%p338_p5, %s2175_s19), 1  ;;  %vm420_vm0 = vcmask 31744   ;;  %vm423_vm1 = vcmask 24576   ;;  %s2907_s14 = smov (!%p370_p8, %s367_s14), 17  ;;  %v658_v25 = vld [vmem:[%s2891_s3] sm:$0xff]  ;;  %vm542_vm2 = vcmask 64545  }
   0xf   : > { %s341_s26 = scalar_select %p340_p6, %s2250_s25, 17  ;;  %838 = vmatpush.msra.mxu1 %v658_v25  ;;  %v1950_v30 = vld [vmem:[%s2891_s3 + $0x8] sm:$0xff]  ;;  %v1983_v32 = vld [vmem:[%s2891_s3 + $0x20] sm:$0xff]  ;;  %vm544_vm3 = vcmask 64544   ;;  %v2018_v35 = vld [vmem:[%s2891_s3 + $0x18] sm:$0xff]  ;;  %vm546_vm4 = vcmask 58400  }
  0x10   : > { %s2255_s27 = smul.u32 54, %s2905_s19  ;;  %s1948_s29 = sshll.u32 %s2905_s19, 6  ;;  %v1984_v31 = vld [vmem:[%s2891_s3 + $0x28] sm:$0xff]  ;;  %725 = vmatpush.msra.mxu0 %v1950_v30  ;;  %1039 = vmatpush.msra.mxu3 %v1983_v32  ;;  %v2017_v36 = vld [vmem:[%s2891_s3 + $0x10] sm:$0xff]  ;;  %v2052_v37 = vld [vmem:[%s2891_s3 + $0x38] sm:$0xff]  ;;  %vm661_vm5 = vcmask 64512  }
  0x11   : > { %s2103_s28 = smul.u32 3, %s341_s26  ;;  %s2909_s17 = smov (!%p357_p9, %s354_s17), 17  ;;  %974 = vmatpush.msra.mxu2 %v1984_v31  ;;  %1333 = vmatpush.msrb.mxu1 %v2017_v36  ;;  %v2051_v38 = vld [vmem:[%s2891_s3 + $0x30] sm:$0xff] }
  0x12   : > { %s383_s30 = scalar_select %p382_p7, %s2250_s25, 15  ;;  %1220 = vmatpush.msrb.mxu0 %v2018_v35  ;;  %1531 = vmatpush.msrb.mxu3 %v2051_v38 }
  0x13   : > { %s344_s6 = sadd.s32 %s2255_s27, %s2103_s28  ;;  %s2106_s15 = smul.u32 3, %s2907_s14  ;;  %1466 = vmatpush.msrb.mxu2 %v2052_v37 }
  0x14   : > { %s1941_s7 = sshll.u32 %s344_s6, 3  ;;  %s1947_s8 = sshll.u32 %s383_s30, 2 }
  0x15   : > { %s2262_s11 = scalar_lea.vmem %s2888_s0, %s1941_s7  ;;  %s2264_s12 = sadd.s32 %s1948_s29, %s1947_s8 }
  0x16   : > { %v396_v0 = vld [vmem:[%s2262_s11 + $0x30] sm:$0xff]  ;;  %v393_v1 = vld [vmem:[%s2262_s11 + $0x18] sm:$0xff]  ;;  %v390_v2 = vld [vmem:[%s2262_s11] sm:$0xff]  ;;  %s2295_s16 = sadd.s32 %s2106_s15, %s2255_s27  ;;  %s2105_s18 = smul.u32 3, %s2909_s17 }
  0x17   : > { %482 = vrot.lane.b32.xlu1 %v396_v0, %s2189_s13  ;;  %428 = vst.msk [vmem:[#allocation2 + $0x30] sm:$0xff] %vm420_vm0, %v396_v0  ;;  %476 = vrot.lane.b32.xlu0 %v393_v1, %s2189_s13  ;;  %v397_v3 = vld [vmem:[%s2262_s11 + $0x38] sm:$0xff]  ;;  %v394_v4 = vld [vmem:[%s2262_s11 + $0x20] sm:$0xff]  ;;  %s1945_s6 = sshll.u32 %s2295_s16, 3  ;;  %s1949_s8 = sshll.u32 %s2264_s12, 3 }
  0x18   : > { %425 = vst.msk [vmem:[#allocation2 + $0x18] sm:$0xff] %vm420_vm0, %v393_v1  ;;  %470 = vrot.lane.b32.xlu2 %v390_v2, %s2189_s13  ;;  %v398_v5 = vld [vmem:[%s2262_s11 + $0x40] sm:$0x3]  ;;  %v395_v6 = vld [vmem:[%s2262_s11 + $0x28] sm:$0x3]  ;;  %v400_v8 = vld [vmem:[%s2262_s11 + $0x50] sm:$0xff]  ;;  %s361_s19 = sadd.s32 %s2105_s18, %s2255_s27  ;;  %s2355_s9 = scalar_lea.vmem %s2890_s2, %s1945_s6 }
  0x19   : > { %429 = vst.msk [vmem:[#allocation2 + $0x38] sm:$0xff] %vm420_vm0, %v397_v3  ;;  %v391_v7 = vld [vmem:[%s2262_s11 + $0x8] sm:$0xff]  ;;  %v392_v10 = vld [vmem:[%s2262_s11 + $0x10] sm:$0x3]  ;;  %v402_v12 = vld [vmem:[%s2262_s11 + $0x60] sm:$0xff]  ;;  %s1943_s26 = sshll.u32 %s361_s19, 3 }
  0x1a   : > { %426 = vst.msk [vmem:[#allocation2 + $0x20] sm:$0xff] %vm420_vm0, %v394_v4  ;;  %v399_v9 = vld [vmem:[%s2262_s11 + $0x48] sm:$0xff]  ;;  %v401_v13 = vld [vmem:[%s2262_s11 + $0x58] sm:$0x3]  ;;  %v406_v14 = vld [vmem:[%s2262_s11 + $0x80] sm:$0xff]  ;;  %s363_s29 = scalar_lea.vmem %s2889_s1, %s1943_s26 }
  0x1b   : > { %421 = vst.msk [vmem:[#allocation2] sm:$0xff] %vm420_vm0, %v390_v2  ;;  %v403_v11 = vld [vmem:[%s2262_s11 + $0x68] sm:$0xff]  ;;  %v405_v15 = vld [vmem:[%s2262_s11 + $0x78] sm:$0xff]  ;;  %v404_v16 = vld [vmem:[%s2262_s11 + $0x70] sm:$0x3] }
  0x1c   : > { %430 = vst.msk [vmem:[#allocation2 + $0x40] sm:$0x1] %vm423_vm1, %v398_v5  ;;  %v409_v17 = vld [vmem:[%s2262_s11 + $0x98] sm:$0xff]  ;;  %v408_v18 = vld [vmem:[%s2262_s11 + $0x90] sm:$0xff]  ;;  %v407_v19 = vld [vmem:[%s2262_s11 + $0x88] sm:$0x3] }
  0x1d   : > { %427 = vst.msk [vmem:[#allocation2 + $0x28] sm:$0x1] %vm423_vm1, %v395_v6  ;;  %v412_v20 = vld [vmem:[%s2262_s11 + $0xb0] sm:$0xff]  ;;  %v411_v21 = vld [vmem:[%s2262_s11 + $0xa8] sm:$0xff]  ;;  %v410_v22 = vld [vmem:[%s2262_s11 + $0xa0] sm:$0x3] }
  0x1e   : > { %422 = vst.msk [vmem:[#allocation2 + $0x8] sm:$0xff] %vm420_vm0, %v391_v7  ;;  %v415_v23 = vld [vmem:[%s363_s29 + $0x8] sm:$0xff]  ;;  %v414_v24 = vld [vmem:[%s363_s29] sm:$0xff]  ;;  %v413_v26 = vld [vmem:[%s2262_s11 + $0xb8] sm:$0x3]  ;;  %s2691_s11 = scalar_lea.vmem %s2893_s5, %s1949_s8 }
  0x1f   : > { %484 = vrot.lane.b32.xlu1 %v397_v3, %s2189_s13  ;;  %478 = vrot.lane.b32.xlu0 %v394_v4, %s2189_s13  ;;  %432 = vst.msk [vmem:[#allocation2 + $0x50] sm:$0xff] %vm420_vm0, %v400_v8  ;;  %v418_v27 = vld [vmem:[%s2355_s9 + $0x8] sm:$0xff]  ;;  %v417_v28 = vld [vmem:[%s2355_s9] sm:$0xff] }
  0x20   : > { %472 = vrot.lane.b32.xlu2 %v391_v7, %s2189_s13  ;;  %431 = vst.msk [vmem:[#allocation2 + $0x48] sm:$0xff] %vm420_vm0, %v399_v9  ;;  %v416_v33 = vld [vmem:[%s363_s29 + $0x10] sm:$0x3] }
  0x21   : > { %424 = vst.msk [vmem:[#allocation2 + $0x10] sm:$0x1] %vm423_vm1, %v392_v10  ;;  %v419_v41 = vld [vmem:[%s2355_s9 + $0x10] sm:$0x3] }
  0x22   : > { %435 = vst.msk [vmem:[#allocation2 + $0x68] sm:$0xff] %vm420_vm0, %v403_v11 }
  0x23   : > { %434 = vst.msk [vmem:[#allocation2 + $0x60] sm:$0xff] %vm420_vm0, %v402_v12 }
  0x24   : > { %433 = vst.msk [vmem:[#allocation2 + $0x58] sm:$0x1] %vm423_vm1, %v401_v13 }
  0x25   : > { %438 = vst.msk [vmem:[#allocation2 + $0x80] sm:$0xff] %vm420_vm0, %v406_v14 }
  0x26   : > { %437 = vst.msk [vmem:[#allocation2 + $0x78] sm:$0xff] %vm420_vm0, %v405_v15 }
  0x27   : > { %486 = vrot.lane.b32.xlu1 %v398_v5, %s2189_s13  ;;  %480 = vrot.lane.b32.xlu0 %v395_v6, %s2189_s13  ;;  %436 = vst.msk [vmem:[#allocation2 + $0x70] sm:$0x1] %vm423_vm1, %v404_v16 }
  0x28   : > { %474 = vrot.lane.b32.xlu2 %v392_v10, %s2189_s13  ;;  %441 = vst.msk [vmem:[#allocation2 + $0x98] sm:$0xff] %vm420_vm0, %v409_v17 }
  0x29   : > { %440 = vst.msk [vmem:[#allocation2 + $0x90] sm:$0xff] %vm420_vm0, %v408_v18 }
  0x2a   : > { %439 = vst.msk [vmem:[#allocation2 + $0x88] sm:$0x1] %vm423_vm1, %v407_v19 }
  0x2b   : > { %444 = vst.msk [vmem:[#allocation2 + $0xb0] sm:$0xff] %vm420_vm0, %v412_v20 }
  0x2c   : > { %443 = vst.msk [vmem:[#allocation2 + $0xa8] sm:$0xff] %vm420_vm0, %v411_v21 }
  0x2d   : > { %442 = vst.msk [vmem:[#allocation2 + $0xa0] sm:$0x1] %vm423_vm1, %v410_v22 }
  0x2e   : > { %571 = vst.msk [vmem:[#allocation2 + $0xc8] sm:$0xff] %vm420_vm0, %v415_v23 }
  0x2f   : > { %490 = vrot.lane.b32.xlu1 %v400_v8, %s2189_s13  ;;  %488 = vrot.lane.b32.xlu0 %v399_v9, %s2189_s13  ;;  %570 = vst.msk [vmem:[#allocation2 + $0xc0] sm:$0xff] %vm420_vm0, %v414_v24 }
  0x30   : > { %492 = vrot.lane.b32.xlu2 %v401_v13, %s2189_s13  ;;  %445 = vst.msk [vmem:[#allocation2 + $0xb8] sm:$0x1] %vm423_vm1, %v413_v26 }
  0x31   : > { %590 = vst.msk [vmem:[#allocation2 + $0xe0] sm:$0xff] %vm420_vm0, %v418_v27 }
  0x32   : > { %589 = vst.msk [vmem:[#allocation2 + $0xd8] sm:$0xff] %vm420_vm0, %v417_v28 }
  0x33   : > { %572 = vst.msk [vmem:[#allocation2 + $0xd0] sm:$0x1] %vm423_vm1, %v416_v33 }
  0x34   : > { %591 = vst.msk [vmem:[#allocation2 + $0xe8] sm:$0x1] %vm423_vm1, %v419_v41 }
  0x37   : > { %496 = vrot.lane.b32.xlu1 %v403_v11, %s2189_s13  ;;  %494 = vrot.lane.b32.xlu0 %v402_v12, %s2189_s13 }
  0x38   : > { %498 = vrot.lane.b32.xlu2 %v404_v16, %s2189_s13 }
  0x3f   : > { %502 = vrot.lane.b32.xlu1 %v406_v14, %s2189_s13  ;;  %500 = vrot.lane.b32.xlu0 %v405_v15, %s2189_s13 }
  0x40   : > { %504 = vrot.lane.b32.xlu2 %v407_v19, %s2189_s13 }
  0x47   : > { %508 = vrot.lane.b32.xlu1 %v409_v17, %s2189_s13  ;;  %506 = vrot.lane.b32.xlu0 %v408_v18, %s2189_s13 }
  0x48   : > { %510 = vrot.lane.b32.xlu2 %v410_v22, %s2189_s13 }
  0x4f   : > { %514 = vrot.lane.b32.xlu1 %v412_v20, %s2189_s13  ;;  %512 = vrot.lane.b32.xlu0 %v411_v21, %s2189_s13 }
  0x50   : > { %516 = vrot.lane.b32.xlu2 %v413_v26, %s2189_s13 }
  0x57   : > { %578 = vrot.lane.b32.xlu1 %v415_v23, %s2189_s13  ;;  %576 = vrot.lane.b32.xlu0 %v414_v24, %s2189_s13 }
  0x58   : > { %580 = vrot.lane.b32.xlu2 %v416_v33, %s2189_s13 }
  0x5f   : > { %597 = vrot.lane.b32.xlu1 %v418_v27, %s2189_s13  ;;  %595 = vrot.lane.b32.xlu0 %v417_v28, %s2189_s13 }
  0x60   : > { %599 = vrot.lane.b32.xlu2 %v419_v41, %s2189_s13 }
  0x72   : > { %v471_v29 = vpop.permute.xlu2 %470 }
  0x73   : > { %543 = vst.msk [vmem:[#allocation2 - $0x1] sm:$0xfe] %vm542_vm2, %v471_v29 }
  0x7a   : > { %v473_v34 = vpop.permute.xlu2 %472 }
  0x7b   : > { %545 = vst.msk [vmem:[#allocation2 + $0x7] sm:$0xff] %vm544_vm3, %v473_v34 }
  0x82   : > { %v475_v39 = vpop.permute.xlu2 %474  ;;  %v608_v40 = vld [vmem:[#allocation2] sm:$0xff] }
  0x83   : > { %547 = vst.msk [vmem:[#allocation2 + $0xf] sm:$0x3] %vm546_vm4, %v475_v39  ;;  %1967 = vmatmul.msk.f32.vlgmr.msra.gmra.mxu1 %vm661_vm5, %v608_v40  ;;  %v1105_v24 = vld [vmem:[#allocation2 + $0x1] sm:$0xff] }
  0x89   : > { %v483_v42 = vpop.permute.xlu1 %482  ;;  %v477_v43 = vpop.permute.xlu0 %476 }
  0x8a   : > { %551 = vst.msk [vmem:[#allocation2 + $0x2f] sm:$0xfe] %vm542_vm2, %v483_v42  ;;  %v609_v44 = vld [vmem:[#allocation2 + $0x8] sm:$0xff]  ;;  %v493_v45 = vpop.permute.xlu2 %492 }
  0x8b   : > { %548 = vst.msk [vmem:[#allocation2 + $0x17] sm:$0xfe] %vm542_vm2, %v477_v43  ;;  %1968 = vmatmul.msk.f32.gmra.mxu1 %vm661_vm5, %v609_v44  ;;  %v1106_v26 = vld [vmem:[#allocation2 + $0x9] sm:$0xff] }
  0x8c   : > { %556 = vst.msk [vmem:[#allocation2 + $0x57] sm:$0x3] %vm546_vm4, %v493_v45 }
  0x91   : > { %v485_v46 = vpop.permute.xlu1 %484  ;;  %v479_v47 = vpop.permute.xlu0 %478 }
  0x92   : > { %552 = vst.msk [vmem:[#allocation2 + $0x37] sm:$0xff] %vm544_vm3, %v485_v46  ;;  %v499_v48 = vpop.permute.xlu2 %498 }
  0x93   : > { %549 = vst.msk [vmem:[#allocation2 + $0x1f] sm:$0xff] %vm544_vm3, %v479_v47 }
  0x94   : > { %559 = vst.msk [vmem:[#allocation2 + $0x6f] sm:$0x3] %vm546_vm4, %v499_v48 }
  0x99   : > { %v487_v49 = vpop.permute.xlu1 %486  ;;  %v481_v50 = vpop.permute.xlu0 %480  ;;  %v642_v51 = vld [vmem:[#allocation2 + $0x30] sm:$0xff] }
  0x9a   : > { %553 = vst.msk [vmem:[#allocation2 + $0x3f] sm:$0x3] %vm546_vm4, %v487_v49  ;;  %v625_v52 = vld [vmem:[#allocation2 + $0x18] sm:$0xff]  ;;  %1985 = vmatmul.msk.f32.vlgmr.msra.gmra.mxu2 %vm661_vm5, %v642_v51  ;;  %v505_v57 = vpop.permute.xlu2 %504 }
  0x9b   : > { %550 = vst.msk [vmem:[#allocation2 + $0x27] sm:$0x3] %vm546_vm4, %v481_v50  ;;  %1951 = vmatmul.msk.f32.vlgmr.msra.gmra.mxu0 %vm661_vm5, %v625_v52  ;;  %1969 = vmatmul.msk.f32.gmra.mxu1 %vm661_vm5, %v625_v52  ;;  %v1121_v30 = vld [vmem:[#allocation2 + $0x19] sm:$0xff]  ;;  %v1137_v31 = vld [vmem:[#allocation2 + $0x31] sm:$0xff] }
  0x9c   : > { %2001 = vmatmul.msk.f32.vlgmr.msra.gmra.mxu3 %vm661_vm5, %v625_v52  ;;  %562 = vst.msk [vmem:[#allocation2 + $0x87] sm:$0x3] %vm546_vm4, %v505_v57 }
  0xa1   : > { %v491_v53 = vpop.permute.xlu1 %490  ;;  %v489_v54 = vpop.permute.xlu0 %488  ;;  %v643_v55 = vld [vmem:[#allocation2 + $0x38] sm:$0xff] }
  0xa2   : > { %555 = vst.msk [vmem:[#allocation2 + $0x4f] sm:$0xff] %vm544_vm3, %v491_v53  ;;  %v626_v56 = vld [vmem:[#allocation2 + $0x20] sm:$0xff]  ;;  %1986 = vmatmul.msk.f32.gmra.mxu2 %vm661_vm5, %v643_v55  ;;  %v511_v0 = vpop.permute.xlu2 %510 }
  0xa3   : > { %554 = vst.msk [vmem:[#allocation2 + $0x47] sm:$0xfe] %vm542_vm2, %v489_v54  ;;  %1952 = vmatmul.msk.f32.gmra.mxu0 %vm661_vm5, %v626_v56  ;;  %1970 = vmatmul.msk.f32.gmra.mxu1 %vm661_vm5, %v626_v56  ;;  %v1122_v37 = vld [vmem:[#allocation2 + $0x21] sm:$0xff]  ;;  %v1138_v38 = vld [vmem:[#allocation2 + $0x39] sm:$0xff] }
  0xa4   : > { %2002 = vmatmul.msk.f32.gmra.mxu3 %vm661_vm5, %v626_v56  ;;  %565 = vst.msk [vmem:[#allocation2 + $0x9f] sm:$0x3] %vm546_vm4, %v511_v0 }
  0xa9   : > { %v497_v58 = vpop.permute.xlu1 %496  ;;  %v495_v59 = vpop.permute.xlu0 %494  ;;  %v645_v63 = vld [vmem:[#allocation2 + $0x50] sm:$0xff] }
  0xaa   : > { %v644_v60 = vld [vmem:[#allocation2 + $0x48] sm:$0xff]  ;;  %558 = vst.msk [vmem:[#allocation2 + $0x67] sm:$0xff] %vm544_vm3, %v497_v58  ;;  %v517_v7 = vpop.permute.xlu2 %516  ;;  %v1140_v50 = vld [vmem:[#allocation2 + $0x51] sm:$0xff] }
  0xab   : > { %1953 = vmatmul.msk.f32.gmra.mxu0 %vm661_vm5, %v642_v51  ;;  %1971 = vmatmul.msk.f32.gmra.mxu1 %vm661_vm5, %v642_v51  ;;  %557 = vst.msk [vmem:[#allocation2 + $0x5f] sm:$0xfe] %vm542_vm2, %v495_v59  ;;  %v1139_v44 = vld [vmem:[#allocation2 + $0x49] sm:$0xff] }
  0xac   : > { %1987 = vmatmul.msk.f32.gmra.mxu2 %vm661_vm5, %v644_v60  ;;  %2003 = vmatmul.msk.f32.gmra.mxu3 %vm661_vm5, %v642_v51  ;;  %568 = vst.msk [vmem:[#allocation2 + $0xb7] sm:$0x3] %vm546_vm4, %v517_v7 }
  0xb1   : > { %v503_v61 = vpop.permute.xlu1 %502  ;;  %v501_v62 = vpop.permute.xlu0 %500  ;;  %v647_v6 = vld [vmem:[#allocation2 + $0x68] sm:$0xff] }
  0xb2   : > { %561 = vst.msk [vmem:[#allocation2 + $0x7f] sm:$0xff] %vm544_vm3, %v503_v61  ;;  %v646_v1 = vld [vmem:[#allocation2 + $0x60] sm:$0xff]  ;;  %v581_v12 = vpop.permute.xlu2 %580 }
  0xb3   : > { %1954 = vmatmul.msk.f32.gmra.mxu0 %vm661_vm5, %v643_v55  ;;  %1972 = vmatmul.msk.f32.gmra.mxu1 %vm661_vm5, %v643_v55  ;;  %560 = vst.msk [vmem:[#allocation2 + $0x77] sm:$0xfe] %vm542_vm2, %v501_v62  ;;  %v1141_v56 = vld [vmem:[#allocation2 + $0x61] sm:$0xff]  ;;  %v1142_v62 = vld [vmem:[#allocation2 + $0x69] sm:$0xff] }
  0xb4   : > { %1988 = vmatmul.msk.f32.gmra.mxu2 %vm661_vm5, %v645_v63  ;;  %2004 = vmatmul.msk.f32.gmra.mxu3 %vm661_vm5, %v643_v55  ;;  %587 = vst.msk [vmem:[#allocation2 + $0xcf] sm:$0x3] %vm546_vm4, %v581_v12 }
  0xb9   : > { %v509_v2 = vpop.permute.xlu1 %508  ;;  %v507_v3 = vpop.permute.xlu0 %506  ;;  %v649_v11 = vld [vmem:[#allocation2 + $0x80] sm:$0xff] }
  0xba   : > { %564 = vst.msk [vmem:[#allocation2 + $0x97] sm:$0xff] %vm544_vm3, %v509_v2  ;;  %v648_v8 = vld [vmem:[#allocation2 + $0x78] sm:$0xff]  ;;  %v600_v17 = vpop.permute.xlu2 %599 }
  0xbb   : > { %1955 = vmatmul.msk.f32.gmra.mxu0 %vm661_vm5, %v644_v60  ;;  %1973 = vmatmul.msk.f32.gmra.mxu1 %vm661_vm5, %v644_v60  ;;  %563 = vst.msk [vmem:[#allocation2 + $0x8f] sm:$0xfe] %vm542_vm2, %v507_v3 }
  0xbc   : > { %1989 = vmatmul.msk.f32.gmra.mxu2 %vm661_vm5, %v646_v1  ;;  %2005 = vmatmul.msk.f32.gmra.mxu3 %vm661_vm5, %v644_v60  ;;  %606 = vst.msk [vmem:[#allocation2 + $0xe7] sm:$0x3] %vm546_vm4, %v600_v17 }
  0xc1   : > { %v515_v4 = vpop.permute.xlu1 %514  ;;  %v513_v5 = vpop.permute.xlu0 %512  ;;  %v651_v16 = vld [vmem:[#allocation2 + $0x98] sm:$0xff] }
  0xc2   : > { %567 = vst.msk [vmem:[#allocation2 + $0xaf] sm:$0xff] %vm544_vm3, %v515_v4  ;;  %v650_v13 = vld [vmem:[#allocation2 + $0x90] sm:$0xff]  ;;  %v1143_v4 = vld [vmem:[#allocation2 + $0x79] sm:$0xff] }
  0xc3   : > { %1956 = vmatmul.msk.f32.gmra.mxu0 %vm661_vm5, %v645_v63  ;;  %1974 = vmatmul.msk.f32.gmra.mxu1 %vm661_vm5, %v645_v63  ;;  %566 = vst.msk [vmem:[#allocation2 + $0xa7] sm:$0xfe] %vm542_vm2, %v513_v5  ;;  %v1145_v17 = vld [vmem:[#allocation2 + $0x91] sm:$0xff] }
  0xc4   : > { %1990 = vmatmul.msk.f32.gmra.mxu2 %vm661_vm5, %v647_v6  ;;  %2006 = vmatmul.msk.f32.gmra.mxu3 %vm661_vm5, %v645_v63 }
  0xc9   : > { %v579_v9 = vpop.permute.xlu1 %578  ;;  %v577_v10 = vpop.permute.xlu0 %576  ;;  %v653_v19 = vld [vmem:[#allocation2 + $0xb0] sm:$0xff] }
  0xca   : > { %586 = vst.msk [vmem:[#allocation2 + $0xc7] sm:$0xff] %vm544_vm3, %v579_v9  ;;  %v652_v18 = vld [vmem:[#allocation2 + $0xa8] sm:$0xff] }
  0xcb   : > { %1957 = vmatmul.msk.f32.gmra.mxu0 %vm661_vm5, %v646_v1  ;;  %1975 = vmatmul.msk.f32.gmra.mxu1 %vm661_vm5, %v646_v1  ;;  %585 = vst.msk [vmem:[#allocation2 + $0xbf] sm:$0xfe] %vm542_vm2, %v577_v10  ;;  %v1144_v10 = vld [vmem:[#allocation2 + $0x81] sm:$0xff] }
  0xcc   : > { %1991 = vmatmul.msk.f32.gmra.mxu2 %vm661_vm5, %v648_v8  ;;  %2007 = vmatmul.msk.f32.gmra.mxu3 %vm661_vm5, %v646_v1 }
  0xd1   : > { %v598_v14 = vpop.permute.xlu1 %597  ;;  %v596_v15 = vpop.permute.xlu0 %595  ;;  %v655_v21 = vld [vmem:[#allocation2 + $0xc8] sm:$0xff] }
  0xd2   : > { %605 = vst.msk [vmem:[#allocation2 + $0xdf] sm:$0xff] %vm544_vm3, %v598_v14  ;;  %v654_v20 = vld [vmem:[#allocation2 + $0xc0] sm:$0xff] }
  0xd3   : > { %1958 = vmatmul.msk.f32.gmra.mxu0 %vm661_vm5, %v647_v6  ;;  %1976 = vmatmul.msk.f32.gmra.mxu1 %vm661_vm5, %v647_v6  ;;  %604 = vst.msk [vmem:[#allocation2 + $0xd7] sm:$0xfe] %vm542_vm2, %v596_v15 }
  0xd4   : > { %1992 = vmatmul.msk.f32.gmra.mxu2 %vm661_vm5, %v649_v11  ;;  %2008 = vmatmul.msk.f32.gmra.mxu3 %vm661_vm5, %v647_v6 }
  0xd9   : > { %v657_v27 = vld [vmem:[#allocation2 + $0xe0] sm:$0xff] }
  0xda   : > { %v656_v23 = vld [vmem:[#allocation2 + $0xd8] sm:$0xff] }
  0xdb   : > { %1959 = vmatmul.msk.f32.gmra.mxu0 %vm661_vm5, %v648_v8  ;;  %1977 = vmatmul.msk.f32.gmra.mxu1 %vm661_vm5, %v648_v8 }
  0xdc   : > { %1993 = vmatmul.msk.f32.gmra.mxu2 %vm661_vm5, %v650_v13  ;;  %2009 = vmatmul.msk.f32.gmra.mxu3 %vm661_vm5, %v648_v8 }
  0xe3   : > { %1960 = vmatmul.msk.f32.gmra.mxu0 %vm661_vm5, %v649_v11  ;;  %1978 = vmatmul.msk.f32.gmra.mxu1 %vm661_vm5, %v649_v11 }
  0xe4   : > { %1994 = vmatmul.msk.f32.gmra.mxu2 %vm661_vm5, %v651_v16  ;;  %2010 = vmatmul.msk.f32.gmra.mxu3 %vm661_vm5, %v649_v11 }
  0xeb   : > { %1961 = vmatmul.msk.f32.gmra.mxu0 %vm661_vm5, %v650_v13  ;;  %1979 = vmatmul.msk.f32.gmra.mxu1 %vm661_vm5, %v650_v13 }
  0xec   : > { %1995 = vmatmul.msk.f32.gmra.mxu2 %vm661_vm5, %v652_v18  ;;  %2011 = vmatmul.msk.f32.gmra.mxu3 %vm661_vm5, %v650_v13 }
  0xf3   : > { %1962 = vmatmul.msk.f32.gmra.mxu0 %vm661_vm5, %v651_v16  ;;  %1980 = vmatmul.msk.f32.gmra.mxu1 %vm661_vm5, %v651_v16 }
  0xf4   : > { %1996 = vmatmul.msk.f32.gmra.mxu2 %vm661_vm5, %v653_v19  ;;  %2012 = vmatmul.msk.f32.gmra.mxu3 %vm661_vm5, %v651_v16 }
  0xfb   : > { %1963 = vmatmul.msk.f32.gmra.mxu0 %vm661_vm5, %v652_v18  ;;  %1981 = vmatmul.msk.f32.gmra.mxu1 %vm661_vm5, %v652_v18 }
  0xfc   : > { %1997 = vmatmul.msk.f32.gmra.mxu2 %vm661_vm5, %v654_v20  ;;  %2013 = vmatmul.msk.f32.gmra.mxu3 %vm661_vm5, %v652_v18 }
 0x100   : > { %v2480_v22 = vpop.f32.mrf.mxu1 }
 0x103   : > { %1964 = vmatmul.msk.f32.gmra.mxu0 %vm661_vm5, %v653_v19  ;;  %1982 = vmatmul.msk.f32.gmra.mxu1 %vm661_vm5, %v653_v19 }
 0x104   : > { %1998 = vmatmul.msk.f32.gmra.mxu2 %vm661_vm5, %v655_v21  ;;  %2014 = vmatmul.msk.f32.gmra.mxu3 %vm661_vm5, %v653_v19 }
 0x108   : > { %v2486_v25 = vpop.f32.mrf.mxu1 }
 0x10b   : > { %1965 = vmatmul.msk.f32.gmra.mxu0 %vm661_vm5, %v654_v20  ;;  %2035 = vmatmul.msk.f32.vlgmr.msrb.gmra.mxu1 %vm661_vm5, %v1105_v24 }
 0x10c   : > { %1999 = vmatmul.msk.f32.gmra.mxu2 %vm661_vm5, %v656_v23  ;;  %2015 = vmatmul.msk.f32.gmra.mxu3 %vm661_vm5, %v654_v20 }
 0x113   : > { %1966 = vmatmul.msk.f32.gmra.mxu0 %vm661_vm5, %v655_v21  ;;  %2036 = vmatmul.msk.f32.gmra.mxu1 %vm661_vm5, %v1106_v26  ;;  %v1146_v26 = vld [vmem:[#allocation2 + $0x99] sm:$0xff] }
 0x114   : > { %2000 = vmatmul.msk.f32.gmra.mxu2 %vm661_vm5, %v657_v27  ;;  %2016 = vmatmul.msk.f32.gmra.mxu3 %vm661_vm5, %v655_v21 }
 0x118   : > { %v2492_v28 = vpop.f32.mrf.mxu0  ;;  %v2494_v29 = vpop.f32.mrf.mxu1 }
 0x11b   : > { %2019 = vmatmul.msk.f32.vlgmr.msrb.gmra.mxu0 %vm661_vm5, %v1121_v30  ;;  %2037 = vmatmul.msk.f32.gmra.mxu1 %vm661_vm5, %v1121_v30 }
 0x11c   : > { %2053 = vmatmul.msk.f32.vlgmr.msrb.gmra.mxu2 %vm661_vm5, %v1137_v31  ;;  %2069 = vmatmul.msk.f32.vlgmr.msrb.gmra.mxu3 %vm661_vm5, %v1121_v30 }
 0x11d   : > { %v976_v32 = vpop.f32.mrf.mxu2 }
 0x11f   : > { %v1041_v33 = vpop.f32.mrf.mxu3 }
 0x120   : > { %v2500_v34 = vadd.f32 %v1041_v33, %v976_v32  ;;  %v2502_v35 = vpop.f32.mrf.mxu0  ;;  %v2504_v36 = vpop.f32.mrf.mxu1 }
 0x123   : > { %2020 = vmatmul.msk.f32.gmra.mxu0 %vm661_vm5, %v1122_v37  ;;  %2038 = vmatmul.msk.f32.gmra.mxu1 %vm661_vm5, %v1122_v37 }
 0x124   : > { %2054 = vmatmul.msk.f32.gmra.mxu2 %vm661_vm5, %v1138_v38  ;;  %2070 = vmatmul.msk.f32.gmra.mxu3 %vm661_vm5, %v1122_v37 }
 0x125   : > { %v979_v39 = vpop.f32.mrf.mxu2 }
 0x127   : > { %v1044_v40 = vpop.f32.mrf.mxu3 }
 0x128   : > { %v2510_v41 = vadd.f32 %v1044_v40, %v979_v39  ;;  %v2512_v42 = vpop.f32.mrf.mxu0  ;;  %v2514_v43 = vpop.f32.mrf.mxu1 }
 0x12b   : > { %2021 = vmatmul.msk.f32.gmra.mxu0 %vm661_vm5, %v1137_v31  ;;  %2039 = vmatmul.msk.f32.gmra.mxu1 %vm661_vm5, %v1137_v31 }
 0x12c   : > { %2055 = vmatmul.msk.f32.gmra.mxu2 %vm661_vm5, %v1139_v44  ;;  %2071 = vmatmul.msk.f32.gmra.mxu3 %vm661_vm5, %v1137_v31 }
 0x12f   : > { %v982_v45 = vpop.f32.mrf.mxu2  ;;  %v1047_v46 = vpop.f32.mrf.mxu3 }
 0x130   : > { %v2520_v47 = vadd.f32 %v1047_v46, %v982_v45  ;;  %v2522_v48 = vpop.f32.mrf.mxu0  ;;  %v2524_v49 = vpop.f32.mrf.mxu1 }
 0x133   : > { %2022 = vmatmul.msk.f32.gmra.mxu0 %vm661_vm5, %v1138_v38  ;;  %2040 = vmatmul.msk.f32.gmra.mxu1 %vm661_vm5, %v1138_v38 }
 0x134   : > { %2056 = vmatmul.msk.f32.gmra.mxu2 %vm661_vm5, %v1140_v50  ;;  %2072 = vmatmul.msk.f32.gmra.mxu3 %vm661_vm5, %v1138_v38  ;;  %v1147_v38 = vld [vmem:[#allocation2 + $0xa9] sm:$0xff] }
 0x137   : > { %v985_v51 = vpop.f32.mrf.mxu2  ;;  %v1050_v52 = vpop.f32.mrf.mxu3 }
 0x138   : > { %v2530_v53 = vadd.f32 %v1050_v52, %v985_v51  ;;  %v2532_v54 = vpop.f32.mrf.mxu0  ;;  %v2534_v55 = vpop.f32.mrf.mxu1  ;;  %v1148_v51 = vld [vmem:[#allocation2 + $0xb1] sm:$0xff] }
 0x13b   : > { %2023 = vmatmul.msk.f32.gmra.mxu0 %vm661_vm5, %v1139_v44  ;;  %2041 = vmatmul.msk.f32.gmra.mxu1 %vm661_vm5, %v1139_v44 }
 0x13c   : > { %2057 = vmatmul.msk.f32.gmra.mxu2 %vm661_vm5, %v1141_v56  ;;  %2073 = vmatmul.msk.f32.gmra.mxu3 %vm661_vm5, %v1139_v44 }
 0x13f   : > { %v988_v57 = vpop.f32.mrf.mxu2  ;;  %v1053_v58 = vpop.f32.mrf.mxu3 }
 0x140   : > { %v2540_v59 = vadd.f32 %v1053_v58, %v988_v57  ;;  %v2542_v60 = vpop.f32.mrf.mxu0  ;;  %v2544_v61 = vpop.f32.mrf.mxu1 }
 0x143   : > { %2024 = vmatmul.msk.f32.gmra.mxu0 %vm661_vm5, %v1140_v50  ;;  %2042 = vmatmul.msk.f32.gmra.mxu1 %vm661_vm5, %v1140_v50 }
 0x144   : > { %2058 = vmatmul.msk.f32.gmra.mxu2 %vm661_vm5, %v1142_v62  ;;  %2074 = vmatmul.msk.f32.gmra.mxu3 %vm661_vm5, %v1140_v50 }
 0x147   : > { %v991_v63 = vpop.f32.mrf.mxu2  ;;  %v1056_v0 = vpop.f32.mrf.mxu3 }
 0x148   : > { %v2550_v1 = vadd.f32 %v1056_v0, %v991_v63  ;;  %v2552_v2 = vpop.f32.mrf.mxu0  ;;  %v864_v3 = vpop.f32.mrf.mxu1  ;;  %v1149_v0 = vld [vmem:[#allocation2 + $0xc1] sm:$0xff] }
 0x14b   : > { %2025 = vmatmul.msk.f32.gmra.mxu0 %vm661_vm5, %v1141_v56  ;;  %2043 = vmatmul.msk.f32.gmra.mxu1 %vm661_vm5, %v1141_v56 }
 0x14c   : > { %2059 = vmatmul.msk.f32.gmra.mxu2 %vm661_vm5, %v1143_v4  ;;  %2075 = vmatmul.msk.f32.gmra.mxu3 %vm661_vm5, %v1141_v56 }
 0x14f   : > { %v994_v5 = vpop.f32.mrf.mxu2  ;;  %v1059_v6 = vpop.f32.mrf.mxu3 }
 0x150   : > { %v2558_v7 = vadd.f32 %v1059_v6, %v994_v5  ;;  %v2560_v8 = vpop.f32.mrf.mxu0  ;;  %v867_v9 = vpop.f32.mrf.mxu1 }
 0x153   : > { %2026 = vmatmul.msk.f32.gmra.mxu0 %vm661_vm5, %v1142_v62  ;;  %2044 = vmatmul.msk.f32.gmra.mxu1 %vm661_vm5, %v1142_v62 }
 0x154   : > { %2060 = vmatmul.msk.f32.gmra.mxu2 %vm661_vm5, %v1144_v10  ;;  %2076 = vmatmul.msk.f32.gmra.mxu3 %vm661_vm5, %v1142_v62 }
 0x157   : > { %v997_v11 = vpop.f32.mrf.mxu2  ;;  %v1062_v12 = vpop.f32.mrf.mxu3 }
 0x158   : > { %v2566_v13 = vadd.f32 %v1062_v12, %v997_v11  ;;  %v751_v14 = vpop.f32.mrf.mxu0  ;;  %v870_v15 = vpop.f32.mrf.mxu1  ;;  %v1150_v11 = vld [vmem:[#allocation2 + $0xc9] sm:$0xff] }
 0x159   : > { %v2568_v16 = vadd.f32 %v864_v3, %v751_v14 }
 0x15b   : > { %2027 = vmatmul.msk.f32.gmra.mxu0 %vm661_vm5, %v1143_v4  ;;  %2045 = vmatmul.msk.f32.gmra.mxu1 %vm661_vm5, %v1143_v4 }
 0x15c   : > { %2061 = vmatmul.msk.f32.gmra.mxu2 %vm661_vm5, %v1145_v17  ;;  %2077 = vmatmul.msk.f32.gmra.mxu3 %vm661_vm5, %v1143_v4 }
 0x15f   : > { %v1000_v18 = vpop.f32.mrf.mxu2  ;;  %v1065_v19 = vpop.f32.mrf.mxu3 }
 0x160   : > { %v2574_v20 = vadd.f32 %v1065_v19, %v1000_v18  ;;  %v754_v21 = vpop.f32.mrf.mxu0  ;;  %v873_v23 = vpop.f32.mrf.mxu1 }
 0x161   : > { %v2576_v24 = vadd.f32 %v867_v9, %v754_v21  ;;  %v1151_v21 = vld [vmem:[#allocation2 + $0xd9] sm:$0xff] }
 0x163   : > { %2028 = vmatmul.msk.f32.gmra.mxu0 %vm661_vm5, %v1144_v10  ;;  %2046 = vmatmul.msk.f32.gmra.mxu1 %vm661_vm5, %v1144_v10 }
 0x164   : > { %2062 = vmatmul.msk.f32.gmra.mxu2 %vm661_vm5, %v1146_v26  ;;  %2078 = vmatmul.msk.f32.gmra.mxu3 %vm661_vm5, %v1144_v10 }
 0x167   : > { %v1003_v27 = vpop.f32.mrf.mxu2  ;;  %v1068_v30 = vpop.f32.mrf.mxu3 }
 0x168   : > { %v2582_v31 = vadd.f32 %v1068_v30, %v1003_v27  ;;  %v757_v32 = vpop.f32.mrf.mxu0  ;;  %v876_v33 = vpop.f32.mrf.mxu1 }
 0x169   : > { %v2584_v37 = vadd.f32 %v870_v15, %v757_v32 }
 0x16b   : > { %2029 = vmatmul.msk.f32.gmra.mxu0 %vm661_vm5, %v1145_v17  ;;  %2047 = vmatmul.msk.f32.gmra.mxu1 %vm661_vm5, %v1145_v17 }
 0x16c   : > { %2063 = vmatmul.msk.f32.gmra.mxu2 %vm661_vm5, %v1147_v38  ;;  %2079 = vmatmul.msk.f32.gmra.mxu3 %vm661_vm5, %v1145_v17 }
 0x16f   : > { %v1006_v39 = vpop.f32.mrf.mxu2  ;;  %v1071_v40 = vpop.f32.mrf.mxu3 }
 0x170   : > { %v2590_v44 = vadd.f32 %v1071_v40, %v1006_v39  ;;  %v760_v45 = vpop.f32.mrf.mxu0  ;;  %v879_v46 = vpop.f32.mrf.mxu1 }
 0x171   : > { %v2592_v50 = vadd.f32 %v873_v23, %v760_v45 }
 0x173   : > { %2030 = vmatmul.msk.f32.gmra.mxu0 %vm661_vm5, %v1146_v26  ;;  %2048 = vmatmul.msk.f32.gmra.mxu1 %vm661_vm5, %v1146_v26 }
 0x174   : > { %2064 = vmatmul.msk.f32.gmra.mxu2 %vm661_vm5, %v1148_v51  ;;  %2080 = vmatmul.msk.f32.gmra.mxu3 %vm661_vm5, %v1146_v26 }
 0x177   : > { %v1009_v52 = vpop.f32.mrf.mxu2  ;;  %v1074_v56 = vpop.f32.mrf.mxu3 }
 0x178   : > { %v2598_v57 = vadd.f32 %v1074_v56, %v1009_v52  ;;  %v763_v58 = vpop.f32.mrf.mxu0  ;;  %v882_v62 = vpop.f32.mrf.mxu1  ;;  %v2633_v52 = vld [vmem:[%s2892_s4] ss:$0 sm:$0xff] }
 0x179   : > { %v2600_v63 = vadd.f32 %v876_v33, %v763_v58 }
 0x17b   : > { %2031 = vmatmul.msk.f32.gmra.mxu0 %vm661_vm5, %v1147_v38  ;;  %2049 = vmatmul.msk.f32.gmra.mxu1 %vm661_vm5, %v1147_v38 }
 0x17c   : > { %2065 = vmatmul.msk.f32.gmra.mxu2 %vm661_vm5, %v1149_v0  ;;  %2081 = vmatmul.msk.f32.gmra.mxu3 %vm661_vm5, %v1147_v38  ;;  %v1152_v38 = vld [vmem:[#allocation2 + $0xe1] sm:$0xff] }
 0x17f   : > { %v1012_v3 = vpop.f32.mrf.mxu2  ;;  %v1077_v4 = vpop.f32.mrf.mxu3 }
 0x180   : > { %v2606_v5 = vadd.f32 %v1077_v4, %v1012_v3  ;;  %v766_v6 = vpop.f32.mrf.mxu0  ;;  %v885_v9 = vpop.f32.mrf.mxu1 }
 0x181   : > { %v2608_v10 = vadd.f32 %v879_v46, %v766_v6 }
 0x183   : > { %2032 = vmatmul.msk.f32.gmra.mxu0 %vm661_vm5, %v1148_v51  ;;  %2050 = vmatmul.msk.f32.gmra.mxu1 %vm661_vm5, %v1148_v51 }
 0x184   : > { %2066 = vmatmul.msk.f32.gmra.mxu2 %vm661_vm5, %v1150_v11  ;;  %2082 = vmatmul.msk.f32.gmra.mxu3 %vm661_vm5, %v1148_v51 }
 0x187   : > { %v1015_v12 = vpop.f32.mrf.mxu2  ;;  %v1080_v14 = vpop.f32.mrf.mxu3 }
 0x188   : > { %v2614_v15 = vadd.f32 %v1080_v14, %v1015_v12  ;;  %v769_v17 = vpop.f32.mrf.mxu0  ;;  %v1335_v18 = vpop.f32.mrf.mxu1 }
 0x189   : > { %v2616_v19 = vadd.f32 %v882_v62, %v769_v17 }
 0x18b   : > { %2033 = vmatmul.msk.f32.gmra.mxu0 %vm661_vm5, %v1149_v0 }
 0x18c   : > { %2067 = vmatmul.msk.f32.gmra.mxu2 %vm661_vm5, %v1151_v21  ;;  %2083 = vmatmul.msk.f32.gmra.mxu3 %vm661_vm5, %v1149_v0 }
 0x18f   : > { %v1018_v23 = vpop.f32.mrf.mxu2  ;;  %v1083_v26 = vpop.f32.mrf.mxu3 }
 0x190   : > { %v2621_v27 = vadd.f32 %v1083_v26, %v1018_v23  ;;  %v772_v30 = vpop.f32.mrf.mxu0  ;;  %v1338_v32 = vpop.f32.mrf.mxu1 }
 0x191   : > { %v2623_v33 = vadd.f32 %v885_v9, %v772_v30 }
 0x193   : > { %2034 = vmatmul.msk.f32.gmra.mxu0 %vm661_vm5, %v1150_v11 }
 0x194   : > { %2068 = vmatmul.msk.f32.gmra.mxu2 %vm661_vm5, %v1152_v38  ;;  %2084 = vmatmul.msk.f32.gmra.mxu3 %vm661_vm5, %v1150_v11 }
 0x197   : > { %v1021_v39 = vpop.f32.mrf.mxu2  ;;  %v1086_v40 = vpop.f32.mrf.mxu3 }
 0x198   : > { %v2628_v45 = vadd.f32 %v1086_v40, %v1021_v39  ;;  %v1222_v46 = vpop.f32.mrf.mxu0  ;;  %v1341_v51 = vpop.f32.mrf.mxu1 }
 0x199   : > { %v1336_v56 = vadd.f32 %v1335_v18, %v1222_v46 }
 0x19b   : > { %v1383_v58 = vadd.f32 %v2633_v52, %v1336_v56 }
 0x19d   : > { %1613 = vrot.lane.b32.xlu0 %v1383_v58, %s2189_s13 }
 0x19f   : > { %v1468_v62 = vpop.f32.mrf.mxu2  ;;  %v1533_v0 = vpop.f32.mrf.mxu3 }
 0x1a0   : > { %v1534_v3 = vadd.f32 %v1533_v0, %v1468_v62  ;;  %v1225_v4 = vpop.f32.mrf.mxu0  ;;  %v1344_v6 = vpop.f32.mrf.mxu1 }
 0x1a1   : > { %v1339_v11 = vadd.f32 %v1338_v32, %v1225_v4 }
 0x1a2   : > { %v1581_v9 = vadd.f32 %v2633_v52, %v1534_v3 }
 0x1a3   : > { %v1384_v18 = vadd.f32 %v2633_v52, %v1339_v11 }
 0x1a4   : > { %1709 = vrot.lane.b32.xlu1 %v1581_v9, %s2189_s13 }
 0x1a7   : > { %v1471_v12 = vpop.f32.mrf.mxu2  ;;  %v1536_v14 = vpop.f32.mrf.mxu3 }
 0x1a8   : > { %v1537_v17 = vadd.f32 %v1536_v14, %v1471_v12  ;;  %v1228_v21 = vpop.f32.mrf.mxu0  ;;  %v1347_v23 = vpop.f32.mrf.mxu1 }
 0x1a9   : > { %v1342_v30 = vadd.f32 %v1341_v51, %v1228_v21 }
 0x1aa   : > { %v1582_v26 = vadd.f32 %v2633_v52, %v1537_v17 }
 0x1ab   : > { %v1385_v32 = vadd.f32 %v2633_v52, %v1342_v30 }
 0x1ac   : > { %1711 = vrot.lane.b32.xlu2 %v1582_v26, %s2189_s13  ;;  %1615 = vrot.lane.b32.xlu1 %v1384_v18, %s2189_s13 }
 0x1af   : > { %v1474_v38 = vpop.f32.mrf.mxu2  ;;  %v1539_v39 = vpop.f32.mrf.mxu3 }
 0x1b0   : > { %v1540_v40 = vadd.f32 %v1539_v39, %v1474_v38  ;;  %v1231_v46 = vpop.f32.mrf.mxu0  ;;  %v1350_v56 = vpop.f32.mrf.mxu1 }
 0x1b1   : > { %v1345_v62 = vadd.f32 %v1344_v6, %v1231_v46 }
 0x1b2   : > { %v1583_v58 = vadd.f32 %v2633_v52, %v1540_v40 }
 0x1b3   : > { %v1386_v51 = vadd.f32 %v2633_v52, %v1345_v62 }
 0x1b4   : > { %1617 = vrot.lane.b32.xlu2 %v1385_v32, %s2189_s13  ;;  %1713 = vrot.lane.b32.xlu0 %v1583_v58, %s2189_s13 }
 0x1b7   : > { %v1477_v0 = vpop.f32.mrf.mxu2  ;;  %v1542_v3 = vpop.f32.mrf.mxu3 }
 0x1b8   : > { %v1543_v4 = vadd.f32 %v1542_v3, %v1477_v0  ;;  %v1234_v9 = vpop.f32.mrf.mxu0  ;;  %v1353_v11 = vpop.f32.mrf.mxu1 }
 0x1b9   : > { %v1348_v14 = vadd.f32 %v1347_v23, %v1234_v9 }
 0x1ba   : > { %v1584_v12 = vadd.f32 %v2633_v52, %v1543_v4 }
 0x1bb   : > { %v1387_v6 = vadd.f32 %v2633_v52, %v1348_v14 }
 0x1bc   : > { %1715 = vrot.lane.b32.xlu1 %v1584_v12, %s2189_s13  ;;  %1619 = vrot.lane.b32.xlu0 %v1386_v51, %s2189_s13 }
 0x1bf   : > { %v1480_v17 = vpop.f32.mrf.mxu2  ;;  %v1545_v21 = vpop.f32.mrf.mxu3 }
 0x1c0   : > { %v1546_v18 = vadd.f32 %v1545_v21, %v1480_v17  ;;  %v1237_v26 = vpop.f32.mrf.mxu0  ;;  %v1356_v30 = vpop.f32.mrf.mxu1 }
 0x1c1   : > { %v1351_v39 = vadd.f32 %v1350_v56, %v1237_v26 }
 0x1c2   : > { %v1585_v38 = vadd.f32 %v2633_v52, %v1546_v18 }
 0x1c3   : > { %v1388_v23 = vadd.f32 %v2633_v52, %v1351_v39 }
 0x1c4   : > { %1717 = vrot.lane.b32.xlu2 %v1585_v38, %s2189_s13  ;;  %1621 = vrot.lane.b32.xlu1 %v1387_v6, %s2189_s13 }
 0x1c7   : > { %v1483_v40 = vpop.f32.mrf.mxu2  ;;  %v1548_v46 = vpop.f32.mrf.mxu3 }
 0x1c8   : > { %v1549_v32 = vadd.f32 %v1548_v46, %v1483_v40  ;;  %v1240_v58 = vpop.f32.mrf.mxu0  ;;  %v1359_v62 = vpop.f32.mrf.mxu1 }
 0x1c9   : > { %v1354_v3 = vadd.f32 %v1353_v11, %v1240_v58 }
 0x1ca   : > { %v1586_v0 = vadd.f32 %v2633_v52, %v1549_v32 }
 0x1cb   : > { %v1389_v56 = vadd.f32 %v2633_v52, %v1354_v3 }
 0x1cc   : > { %1623 = vrot.lane.b32.xlu2 %v1388_v23, %s2189_s13  ;;  %1719 = vrot.lane.b32.xlu0 %v1586_v0, %s2189_s13 }
 0x1cf   : > { %v1486_v4 = vpop.f32.mrf.mxu2  ;;  %v1551_v9 = vpop.f32.mrf.mxu3 }
 0x1d0   : > { %v1552_v51 = vadd.f32 %v1551_v9, %v1486_v4  ;;  %v1243_v12 = vpop.f32.mrf.mxu0  ;;  %v1362_v17 = vpop.f32.mrf.mxu1 }
 0x1d1   : > { %v1357_v21 = vadd.f32 %v1356_v30, %v1243_v12 }
 0x1d2   : > { %v1587_v14 = vadd.f32 %v2633_v52, %v1552_v51 }
 0x1d3   : > { %v1390_v11 = vadd.f32 %v2633_v52, %v1357_v21 }
 0x1d4   : > { %1721 = vrot.lane.b32.xlu1 %v1587_v14, %s2189_s13  ;;  %1625 = vrot.lane.b32.xlu0 %v1389_v56, %s2189_s13 }
 0x1d7   : > { %v1489_v18 = vpop.f32.mrf.mxu2  ;;  %v1554_v26 = vpop.f32.mrf.mxu3 }
 0x1d8   : > { %v1555_v6 = vadd.f32 %v1554_v26, %v1489_v18  ;;  %v1246_v38 = vpop.f32.mrf.mxu0  ;;  %v1365_v40 = vpop.f32.mrf.mxu1 }
 0x1d9   : > { %v1360_v46 = vadd.f32 %v1359_v62, %v1246_v38 }
 0x1da   : > { %v1588_v39 = vadd.f32 %v2633_v52, %v1555_v6 }
 0x1db   : > { %v1391_v30 = vadd.f32 %v2633_v52, %v1360_v46 }
 0x1dc   : > { %1723 = vrot.lane.b32.xlu2 %v1588_v39, %s2189_s13  ;;  %1627 = vrot.lane.b32.xlu1 %v1390_v11, %s2189_s13 }
 0x1df   : > { %v1492_v32 = vpop.f32.mrf.mxu2  ;;  %v1557_v58 = vpop.f32.mrf.mxu3 }
 0x1e0   : > { %v1558_v23 = vadd.f32 %v1557_v58, %v1492_v32  ;;  %v1249_v0 = vpop.f32.mrf.mxu0  ;;  %v1368_v9 = vpop.f32.mrf.mxu1 }
 0x1e1   : > { %v1363_v4 = vadd.f32 %v1362_v17, %v1249_v0 }
 0x1e2   : > { %v1589_v3 = vadd.f32 %v2633_v52, %v1558_v23 }
 0x1e3   : > { %v1392_v62 = vadd.f32 %v2633_v52, %v1363_v4 }
 0x1e4   : > { %1629 = vrot.lane.b32.xlu2 %v1391_v30, %s2189_s13  ;;  %1725 = vrot.lane.b32.xlu0 %v1589_v3, %s2189_s13 }
 0x1e7   : > { %v1495_v51 = vpop.f32.mrf.mxu2  ;;  %v1560_v12 = vpop.f32.mrf.mxu3 }
 0x1e8   : > { %v1561_v56 = vadd.f32 %v1560_v12, %v1495_v51  ;;  %v1252_v14 = vpop.f32.mrf.mxu0  ;;  %v1371_v38 = vpop.f32.mrf.mxu1 }
 0x1e9   : > { %v1366_v18 = vadd.f32 %v1365_v40, %v1252_v14 }
 0x1ea   : > { %v1590_v21 = vadd.f32 %v2633_v52, %v1561_v56 }
 0x1eb   : > { %v1393_v17 = vadd.f32 %v2633_v52, %v1366_v18 }
 0x1ec   : > { %1727 = vrot.lane.b32.xlu1 %v1590_v21, %s2189_s13  ;;  %1631 = vrot.lane.b32.xlu0 %v1392_v62, %s2189_s13 }
 0x1ef   : > { %v1498_v26 = vpop.f32.mrf.mxu2  ;;  %v1563_v6 = vpop.f32.mrf.mxu3 }
 0x1f0   : > { %v1564_v11 = vadd.f32 %v1563_v6, %v1498_v26  ;;  %v1255_v39 = vpop.f32.mrf.mxu0  ;;  %v1374_v3 = vpop.f32.mrf.mxu1  ;;  %v1090_v26 = vadd.f32 %v2633_v52, %v2510_v41 }
 0x1f1   : > { %v1369_v32 = vadd.f32 %v1368_v9, %v1255_v39 }
 0x1f2   : > { %v1591_v46 = vadd.f32 %v2633_v52, %v1564_v11 }
 0x1f3   : > { %v1394_v40 = vadd.f32 %v2633_v52, %v1369_v32  ;;  %v847_v32 = vadd.f32 %v2494_v29, %v2512_v42 }
 0x1f4   : > { %1729 = vrot.lane.b32.xlu2 %v1591_v46, %s2189_s13  ;;  %1633 = vrot.lane.b32.xlu1 %v1393_v17, %s2189_s13 }
 0x1f7   : > { %v1501_v58 = vpop.f32.mrf.mxu2  ;;  %v1566_v23 = vpop.f32.mrf.mxu3 }
 0x1f8   : > { %v1567_v0 = vadd.f32 %v1566_v23, %v1501_v58  ;;  %v1258_v30 = vpop.f32.mrf.mxu0  ;;  %v1377_v18 = vpop.f32.mrf.mxu1 }
 0x1f9   : > { %v1372_v51 = vadd.f32 %v1371_v38, %v1258_v30  ;;  %v893_v30 = vadd.f32 %v2633_v52, %v847_v32 }
 0x1fa   : > { %v1592_v4 = vadd.f32 %v2633_v52, %v1567_v0  ;;  %v841_v0 = vadd.f32 %v2480_v22, %v2492_v28 }
 0x1fb   : > { %v1395_v9 = vadd.f32 %v2633_v52, %v1372_v51 }
 0x1fc   : > { %1635 = vrot.lane.b32.xlu2 %v1394_v40, %s2189_s13  ;;  %1731 = vrot.lane.b32.xlu0 %v1592_v4, %s2189_s13  ;;  %v891_v4 = vadd.f32 %v2633_v52, %v841_v0 }
 0x1ff   : > { %v1504_v12 = vpop.f32.mrf.mxu2  ;;  %v1569_v56 = vpop.f32.mrf.mxu3 }
 0x200   : > { %v1570_v14 = vadd.f32 %v1569_v56, %v1504_v12  ;;  %v1261_v62 = vpop.f32.mrf.mxu0  ;;  %v1380_v40 = vpop.f32.mrf.mxu1 }
 0x201   : > { %v1375_v6 = vadd.f32 %v1374_v3, %v1261_v62 }
 0x202   : > { %v1593_v21 = vadd.f32 %v2633_v52, %v1570_v14 }
 0x203   : > { %v1396_v23 = vadd.f32 %v2633_v52, %v1375_v6 }
 0x204   : > { %1733 = vrot.lane.b32.xlu1 %v1593_v21, %s2189_s13  ;;  %1637 = vrot.lane.b32.xlu0 %v1395_v9, %s2189_s13  ;;  %v1089_v21 = vadd.f32 %v2633_v52, %v2500_v34 }
 0x206   : > { %v1712_v38 = vpop.permute.xlu2 %1711 }
 0x207   : > { %v1758_v11 = vsel %vm420_vm0, %v1090_v26, %v1712_v38  ;;  %v1507_v39 = vpop.f32.mrf.mxu2  ;;  %v1572_v17 = vpop.f32.mrf.mxu3 }
 0x208   : > { %2086 = vst.msk [vmem:[%s2691_s11 + $0x18] sm:$0xff] %vm661_vm5, %v1758_v11  ;;  %v1264_v46 = vpop.f32.mrf.mxu0  ;;  %v1573_v29 = vadd.f32 %v1572_v17, %v1507_v39  ;;  %v844_v17 = vadd.f32 %v2486_v25, %v2502_v35  ;;  %v856_v35 = vadd.f32 %v2524_v49, %v2542_v60  ;;  %v850_v49 = vadd.f32 %v2504_v36, %v2522_v48 }
 0x209   : > { %v1378_v58 = vadd.f32 %v1377_v18, %v1264_v46  ;;  %v853_v36 = vadd.f32 %v2514_v43, %v2532_v54  ;;  %v1094_v43 = vadd.f32 %v2633_v52, %v2550_v1  ;;  %v899_v54 = vadd.f32 %v2633_v52, %v2568_v16 }
 0x20a   : > { %v1594_v62 = vadd.f32 %v2633_v52, %v1573_v29  ;;  %v892_v32 = vadd.f32 %v2633_v52, %v844_v17  ;;  %v894_v60 = vadd.f32 %v2633_v52, %v850_v49  ;;  %v1095_v16 = vadd.f32 %v2633_v52, %v2558_v7 }
 0x20b   : > { %v1397_v41 = vadd.f32 %v2633_v52, %v1378_v58  ;;  %v1093_v58 = vadd.f32 %v2633_v52, %v2540_v59  ;;  %v1091_v59 = vadd.f32 %v2633_v52, %v2520_v47  ;;  %v1092_v47 = vadd.f32 %v2633_v52, %v2530_v53 }
 0x20c   : > { %1639 = vrot.lane.b32.xlu1 %v1396_v23, %s2189_s13  ;;  %v895_v48 = vadd.f32 %v2633_v52, %v853_v36  ;;  %v1096_v53 = vadd.f32 %v2633_v52, %v2566_v13  ;;  %v1099_v7 = vadd.f32 %v2633_v52, %v2590_v44  ;;  %v904_v36 = vadd.f32 %v2633_v52, %v2608_v10 }
 0x20d   : > { %1641 = vrot.lane.b32.xlu2 %v1397_v41, %s2189_s13 }
 0x20e   : > { %v1618_v3 = vpop.permute.xlu2 %1617 }
 0x20f   : > { %v1663_v42 = vsel %vm420_vm0, %v893_v30, %v1618_v3  ;;  %v1510_v51 = vpop.f32.mrf.mxu2  ;;  %v1575_v12 = vpop.f32.mrf.mxu3  ;;  %v896_v30 = vadd.f32 %v2633_v52, %v856_v35 }
 0x210   : > { %1679 = vst.msk [vmem:[%s2691_s11 + $0x20] sm:$0xff] %vm661_vm5, %v1663_v42  ;;  %v1614_v22 = vpop.permute.xlu0 %1613  ;;  %v1267_v28 = vpop.f32.mrf.mxu0  ;;  %v1576_v26 = vadd.f32 %v1575_v12, %v1510_v51 }
 0x211   : > { %v1661_v56 = vsel %vm420_vm0, %v891_v4, %v1614_v22  ;;  %v1381_v14 = vadd.f32 %v1380_v40, %v1267_v28 }
 0x212   : > { %1677 = vst.msk [vmem:[%s2691_s11] sm:$0xff] %vm661_vm5, %v1661_v56  ;;  %v1595_v46 = vadd.f32 %v2633_v52, %v1576_v26  ;;  %v859_v26 = vadd.f32 %v2534_v55, %v2552_v2  ;;  %v862_v55 = vadd.f32 %v2544_v61, %v2560_v8  ;;  %v1097_v61 = vadd.f32 %v2633_v52, %v2574_v20 }
 0x213   : > { %v1398_v9 = vadd.f32 %v2633_v52, %v1381_v14  ;;  %v902_v8 = vadd.f32 %v2633_v52, %v2592_v50  ;;  %v1098_v20 = vadd.f32 %v2633_v52, %v2582_v31 }
 0x214   : > { %v897_v1 = vadd.f32 %v2633_v52, %v859_v26  ;;  %v898_v2 = vadd.f32 %v2633_v52, %v862_v55 }
 0x215   : > { %1735 = vrot.lane.b32.xlu2 %v1594_v62, %s2189_s13  ;;  %1643 = vrot.lane.b32.xlu0 %v1398_v9, %s2189_s13 }
 0x216   : > { %v1710_v18 = vpop.permute.xlu1 %1709 }
 0x217   : > { %v1757_v6 = vsel %vm420_vm0, %v1089_v21, %v1710_v18  ;;  %v1513_v38 = vpop.f32.mrf.mxu2  ;;  %v1578_v11 = vpop.f32.mrf.mxu3 }
 0x218   : > { %2085 = vst.msk [vmem:[%s2691_s11 + $0x10] sm:$0xff] %vm661_vm5, %v1757_v6  ;;  %v1579_v39 = vadd.f32 %v1578_v11, %v1513_v38 }
 0x21a   : > { %v1596_v34 = vadd.f32 %v2633_v52, %v1579_v39 }
 0x21c   : > { %1739 = vrot.lane.b32.xlu1 %v1596_v34, %s2189_s13 }
 0x21d   : > { %1737 = vrot.lane.b32.xlu0 %v1595_v46, %s2189_s13 }
 0x21e   : > { %v1718_v23 = vpop.permute.xlu2 %1717  ;;  %v1616_v0 = vpop.permute.xlu1 %1615 }
 0x21f   : > { %v1761_v41 = vsel %vm420_vm0, %v1093_v58, %v1718_v23  ;;  %v1662_v25 = vsel %vm420_vm0, %v892_v32, %v1616_v0 }
 0x220   : > { %2089 = vst.msk [vmem:[%s2691_s11 + $0x50] sm:$0xff] %vm661_vm5, %v1761_v41  ;;  %v900_v41 = vadd.f32 %v2633_v52, %v2576_v24  ;;  %v905_v24 = vadd.f32 %v2633_v52, %v2616_v19 }
 0x221   : > { %1678 = vst.msk [vmem:[%s2691_s11 + $0x8] sm:$0xff] %vm661_vm5, %v1662_v25 }
 0x226   : > { %v1624_v40 = vpop.permute.xlu2 %1623  ;;  %v1714_v3 = vpop.permute.xlu0 %1713 }
 0x227   : > { %v1666_v4 = vsel %vm420_vm0, %v896_v30, %v1624_v40  ;;  %v1759_v29 = vsel %vm420_vm0, %v1091_v59, %v1714_v3  ;;  %v901_v30 = vadd.f32 %v2633_v52, %v2584_v37  ;;  %v1102_v37 = vadd.f32 %v2633_v52, %v2614_v15 }
 0x228   : > { %1682 = vst.msk [vmem:[%s2691_s11 + $0x48] sm:$0xff] %vm661_vm5, %v1666_v4 }
 0x229   : > { %2087 = vst.msk [vmem:[%s2691_s11 + $0x30] sm:$0xff] %vm661_vm5, %v1759_v29  ;;  %v1100_v29 = vadd.f32 %v2633_v52, %v2598_v57  ;;  %v1101_v57 = vadd.f32 %v2633_v52, %v2606_v5  ;;  %v906_v5 = vadd.f32 %v2633_v52, %v2623_v33 }
 0x22e   : > { %v1716_v42 = vpop.permute.xlu1 %1715  ;;  %v1620_v51 = vpop.permute.xlu0 %1619 }
 0x22f   : > { %v1760_v12 = vsel %vm420_vm0, %v1092_v47, %v1716_v42  ;;  %v1664_v22 = vsel %vm420_vm0, %v894_v60, %v1620_v51  ;;  %v903_v42 = vadd.f32 %v2633_v52, %v2600_v63 }
 0x230   : > { %2088 = vst.msk [vmem:[%s2691_s11 + $0x38] sm:$0xff] %vm661_vm5, %v1760_v12 }
 0x231   : > { %1680 = vst.msk [vmem:[%s2691_s11 + $0x28] sm:$0xff] %vm661_vm5, %v1664_v22 }
 0x236   : > { %v1724_v28 = vpop.permute.xlu2 %1723  ;;  %v1622_v56 = vpop.permute.xlu1 %1621 }
 0x237   : > { %v1764_v14 = vsel %vm420_vm0, %v1096_v53, %v1724_v28  ;;  %v1665_v62 = vsel %vm420_vm0, %v895_v48, %v1622_v56  ;;  %v1104_v56 = vadd.f32 %v2633_v52, %v2628_v45 }
 0x238   : > { %2092 = vst.msk [vmem:[%s2691_s11 + $0x78] sm:$0xff] %vm661_vm5, %v1764_v14  ;;  %v1103_v14 = vadd.f32 %v2633_v52, %v2621_v27 }
 0x239   : > { %1681 = vst.msk [vmem:[%s2691_s11 + $0x40] sm:$0xff] %vm661_vm5, %v1665_v62 }
 0x23e   : > { %v1630_v9 = vpop.permute.xlu2 %1629  ;;  %v1720_v13 = vpop.permute.xlu0 %1719 }
 0x23f   : > { %v1669_v21 = vsel %vm420_vm0, %v899_v54, %v1630_v9  ;;  %v1762_v18 = vsel %vm420_vm0, %v1094_v43, %v1720_v13 }
 0x240   : > { %1685 = vst.msk [vmem:[%s2691_s11 + $0x80] sm:$0xff] %vm661_vm5, %v1669_v21 }
 0x241   : > { %2090 = vst.msk [vmem:[%s2691_s11 + $0x58] sm:$0xff] %vm661_vm5, %v1762_v18 }
 0x246   : > { %v1722_v6 = vpop.permute.xlu1 %1721  ;;  %v1626_v38 = vpop.permute.xlu0 %1625 }
 0x247   : > { %v1763_v11 = vsel %vm420_vm0, %v1095_v16, %v1722_v6  ;;  %v1667_v39 = vsel %vm420_vm0, %v897_v1, %v1626_v38 }
 0x248   : > { %2091 = vst.msk [vmem:[%s2691_s11 + $0x70] sm:$0xff] %vm661_vm5, %v1763_v11 }
 0x249   : > { %1683 = vst.msk [vmem:[%s2691_s11 + $0x60] sm:$0xff] %vm661_vm5, %v1667_v39 }
 0x24e   : > { %v1730_v17 = vpop.permute.xlu2 %1729  ;;  %v1628_v34 = vpop.permute.xlu1 %1627 }
 0x24f   : > { %v1767_v46 = vsel %vm420_vm0, %v1099_v7, %v1730_v17  ;;  %v1668_v32 = vsel %vm420_vm0, %v898_v2, %v1628_v34 }
 0x250   : > { %2095 = vst.msk [vmem:[%s2691_s11 + $0xb0] sm:$0xff] %vm661_vm5, %v1767_v46 }
 0x251   : > { %1684 = vst.msk [vmem:[%s2691_s11 + $0x68] sm:$0xff] %vm661_vm5, %v1668_v32 }
 0x256   : > { %v1636_v58 = vpop.permute.xlu2 %1635  ;;  %v1726_v44 = vpop.permute.xlu0 %1725 }
 0x257   : > { %v1672_v23 = vsel %vm420_vm0, %v902_v8, %v1636_v58  ;;  %v1765_v0 = vsel %vm420_vm0, %v1097_v61, %v1726_v44 }
 0x258   : > { %1688 = vst.msk [vmem:[%s2691_s11 + $0xa8] sm:$0xff] %vm661_vm5, %v1672_v23 }
 0x259   : > { %2093 = vst.msk [vmem:[%s2691_s11 + $0x90] sm:$0xff] %vm661_vm5, %v1765_v0 }
 0x25e   : > { %v1728_v25 = vpop.permute.xlu1 %1727  ;;  %v1632_v50 = vpop.permute.xlu0 %1631 }
 0x25f   : > { %v1766_v35 = vsel %vm420_vm0, %v1098_v20, %v1728_v25  ;;  %v1670_v59 = vsel %vm420_vm0, %v900_v41, %v1632_v50 }
 0x260   : > { %2094 = vst.msk [vmem:[%s2691_s11 + $0x98] sm:$0xff] %vm661_vm5, %v1766_v35 }
 0x261   : > { %1686 = vst.msk [vmem:[%s2691_s11 + $0x88] sm:$0xff] %vm661_vm5, %v1670_v59 }
 0x266   : > { %v1634_v40 = vpop.permute.xlu1 %1633 }
 0x267   : > { %v1671_v31 = vsel %vm420_vm0, %v901_v30, %v1634_v40  ;;  %v1642_v3 = vpop.permute.xlu2 %1641 }
 0x268   : > { %1687 = vst.msk [vmem:[%s2691_s11 + $0xa0] sm:$0xff] %vm661_vm5, %v1671_v31  ;;  %v1675_v4 = vsel %vm420_vm0, %v905_v24, %v1642_v3 }
 0x269   : > { %1691 = vst.msk [vmem:[%s2691_s11 + $0xe0] sm:$0xff] %vm661_vm5, %v1675_v4 }
 0x26e   : > { %v1732_v49 = vpop.permute.xlu0 %1731 }
 0x26f   : > { %v1768_v19 = vsel %vm420_vm0, %v1100_v29, %v1732_v49  ;;  %v1736_v60 = vpop.permute.xlu2 %1735 }
 0x270   : > { %2096 = vst.msk [vmem:[%s2691_s11 + $0xb8] sm:$0xff] %vm661_vm5, %v1768_v19  ;;  %v1770_v47 = vsel %vm420_vm0, %v1102_v37, %v1736_v60 }
 0x271   : > { %2098 = vst.msk [vmem:[%s2691_s11 + $0xd8] sm:$0xff] %vm661_vm5, %v1770_v47 }
 0x276   : > { %v1734_v51 = vpop.permute.xlu1 %1733  ;;  %v1638_v15 = vpop.permute.xlu0 %1637 }
 0x277   : > { %v1769_v12 = vsel %vm420_vm0, %v1101_v57, %v1734_v51  ;;  %v1673_v22 = vsel %vm420_vm0, %v903_v42, %v1638_v15 }
 0x278   : > { %2097 = vst.msk [vmem:[%s2691_s11 + $0xd0] sm:$0xff] %vm661_vm5, %v1769_v12 }
 0x279   : > { %1689 = vst.msk [vmem:[%s2691_s11 + $0xc0] sm:$0xff] %vm661_vm5, %v1673_v22 }
 0x27e   : > { %v1640_v48 = vpop.permute.xlu1 %1639 }
 0x27f   : > { %v1674_v63 = vsel %vm420_vm0, %v904_v36, %v1640_v48 }
 0x280   : > { %1690 = vst.msk [vmem:[%s2691_s11 + $0xc8] sm:$0xff] %vm661_vm5, %v1674_v63 }
 0x287   : > { %v1644_v53 = vpop.permute.xlu0 %1643 }
 0x288   : > { %v1676_v28 = vsel %vm420_vm0, %v906_v5, %v1644_v53 }
 0x289   : > { %1692 = vst.msk [vmem:[%s2691_s11 + $0xe8] sm:$0xff] %vm661_vm5, %v1676_v28 }
 0x28e   : > { %v1740_v10 = vpop.permute.xlu1 %1739 }
 0x28f   : > { %v1772_v62 = vsel %vm420_vm0, %v1104_v56, %v1740_v10  ;;  %v1738_v43 = vpop.permute.xlu0 %1737 }
 0x290   : > { %2100 = vst.msk [vmem:[%s2691_s11 + $0xf8] sm:$0xff] %vm661_vm5, %v1772_v62  ;;  %v1771_v54 = vsel %vm420_vm0, %v1103_v14, %v1738_v43 }
 0x291   : > { %2099 = vst.msk [vmem:[%s2691_s11 + $0xf0] sm:$0xff] %vm661_vm5, %v1771_v54 }
 0x292 PF: > { %s15_s22 = sadd.s32 1, %s2187_s22   ;;  %s2894_s18 = smov %s2179_s20 }
 0x293   : > { %p12_p10 = scmp.ge.s32.totalorder %s15_s22, 6   ;;  %s2895_s19 = smov %s2183_s21 }
 0x294   : > { %s2896_s20 = smov %s2899_s23  ;;  %s2897_s21 = smov %s2903_s24 }
 0x295   :  { %14 = sbr.rel (!%p12_p10) target bundleno = 3 (0x3), region = 88 }

</bundles_post_ra>
